<compile_context>
chip_gen: v7x
topology: tpu7x:2x2x1
jax: 0.10.0
libtpu: 0.0.40
codegen_flags: <defaults>
</compile_context>

<pallas_src>
import functools

import jax
import jax.numpy as jnp
from jax import lax
from jax.experimental import pallas as pl
from jax.experimental.pallas import tpu as pltpu


# For stride-2, pad-1, k=3: input index 2*o + k - 1 == 2*(o + d) + p, so the
# kernel-tap index k in {0,1,2} maps to (phase p, output-grid offset d).
_TAP_PHASE_OFFSET = ((1, -1), (0, 0), (1, 0))


def _round_up(x, m):
    return (x + m - 1) // m * m


def _pick_tile_depth(Do, HoWo, max_lanes):
    """Largest output-depth tile whose lane count is 128-aligned and fits."""
    aligned = [td for td in range(1, Do + 1)
               if Do % td == 0 and (td * HoWo) % 128 == 0]
    if not aligned:
        return Do                      # single tile: block == full extent
    fitting = [td for td in aligned if td * HoWo <= max_lanes]
    return max(fitting) if fitting else min(aligned)


def _conv_stats_kernel(xc_ref, w_ref, b_ref, out_ref, sum_ref, sq_ref,
                       patch_ref, *, cin_p, wo, howo):
    # xc_ref:    (1, 12*cin_p, Ts) bf16.  Rows [p*cin_p, (p+1)*cin_p), p < 8,
    #            hold phase p = pd*4 + ph*2 + pw of the stride-2 decomposition;
    #            rows [(8+q)*cin_p, ...) hold the pd=1 phases (q = ph*2 + pw)
    #            pre-shifted by one output-depth row (zeros at od == 0), used
    #            by the kd == 0 taps -> no cross-tile halo needed.
    # w_ref:     (3, Cout, 9*cin_p) bf16, one kd-chunk per leading index,
    #            columns ordered (kh, kw, cin).
    # b_ref:     (Cout, 1) f32 conv bias.
    # out_ref:   (1, Cout, Ts) f32 conv-output tile (pre-norm).
    # sum_ref:   (1, 1, Cout, 1) f32 per-tile sum        (InstanceNorm pass 2)
    # sq_ref:    (1, 1, Cout, 1) f32 per-tile sum of squares
    # patch_ref: (2, 9*cin_p, Ts) bf16 ping-pong im2col chunk scratch.
    cout = out_ref.shape[1]
    ts = out_ref.shape[2]

    # Hoisted H/W border masks (destination-lane based; tile-invariant because
    # a tile is a whole number of output-depth rows).
    lane = lax.broadcasted_iota(jnp.int32, (1, ts), 1)
    mh = ((lane % howo) >= wo).astype(jnp.bfloat16)    # 0 where oh == 0
    mw = ((lane % wo) != 0).astype(jnp.bfloat16)       # 0 where ow == 0
    mhw = mh * mw

    acc = None
    for kd in range(3):
        buf = kd & 1
        for kh in range(3):
            ph, dh = _TAP_PHASE_OFFSET[kh]
            for kw in range(3):
                pw, dw = _TAP_PHASE_OFFSET[kw]
                # Source row group in xc for this tap.
                if kd == 0:                         # depth-shifted pd=1 copy
                    src0 = (8 + ph * 2 + pw) * cin_p
                elif kd == 1:                       # pd = 0 phases
                    src0 = (ph * 2 + pw) * cin_p
                else:                               # pd = 1 phases
                    src0 = (4 + ph * 2 + pw) * cin_p
                src = xc_ref[0, src0:src0 + cin_p, :]         # (cin_p, Ts)
                row0 = (kh * 3 + kw) * cin_p
                shift = (-dh) * wo + (-dw)                    # 0, 1, wo, wo+1
                if shift:
                    mask = mhw if (dh and dw) else (mh if dh else mw)
                    val = src[:, :ts - shift] * mask[:, shift:]
                    patch_ref[buf, row0:row0 + cin_p, :shift] = jnp.zeros(
                        (cin_p, shift), jnp.bfloat16)
                    patch_ref[buf, row0:row0 + cin_p, shift:] = val
                else:
                    patch_ref[buf, row0:row0 + cin_p, :] = src
        # One MXU matmul per kd-plane, K = 9*cin_p, f32 accumulation.
        part = jnp.dot(w_ref[kd], patch_ref[buf],
                       preferred_element_type=jnp.float32)    # (Cout, Ts)
        acc = part if acc is None else acc + part

    acc = acc + b_ref[...]                                    # conv bias
    out_ref[0] = acc
    sum_ref[0, 0] = jnp.sum(acc, axis=1, keepdims=True)
    sq_ref[0, 0] = jnp.sum(acc * acc, axis=1, keepdims=True)


def _norm_act_kernel(y_ref, mean_ref, rstd_ref, o_ref, *, slope):
    # Single pass over the conv output: center, scale, LeakyReLU, store.
    y = (y_ref[0] - mean_ref[0]) * rstd_ref[0]
    o_ref[0] = jnp.where(y >= 0.0, y, slope * y)


@functools.partial(jax.jit,
                   static_argnames=("eps", "negative_slope", "max_tile_lanes"))
def unet_down_forward(x, weight, bias, *, eps=1e-5, negative_slope=0.2,
                      max_tile_lanes=2048):
    """UNetDown forward.

    x:      (N, Cin, D, H, W)    f32, PyTorch NCDHW layout
    weight: (Cout, Cin, 3, 3, 3) PyTorch Conv3d layout
    bias:   (Cout,)
    returns (N, Cout, D//2, H//2, W//2) f32
    """
    N, Cin, D, H, W = x.shape
    Cout = weight.shape[0]
    assert D % 2 == 0 and H % 2 == 0 and W % 2 == 0, "even spatial dims expected"
    Do, Ho, Wo = D // 2, H // 2, W // 2
    assert Do >= 2 and Ho >= 2 and Wo >= 2, "spatial dims must be >= 4"
    HoWo = Ho * Wo
    S = Do * HoWo

    # Channel padding -> sublane-aligned tap row blocks.
    Cin_p = _round_up(Cin, 8)

    # ---- single wrapper-side layout transform (NCDHW -> phase/lane layout) --
    xpad = jnp.pad(x, ((0, 0), (0, Cin_p - Cin), (0, 0), (0, 0), (0, 0)))
    xr = xpad.reshape(N, Cin_p, Do, 2, Ho, 2, Wo, 2)
    # (N, pd, ph, pw, c, Do, Ho, Wo) -> rows ordered (phase, cin)
    xp = jnp.transpose(xr, (0, 3, 5, 7, 1, 2, 4, 6)).reshape(
        N, 8 * Cin_p, Do, HoWo)
    # Depth-shifted copy of the pd=1 phases for the kd == 0 taps:
    # xps[..., od, :] = pd1[..., od-1, :] (zeros at od == 0).
    xp1 = xp[:, 4 * Cin_p:, :, :]
    xps = jnp.concatenate(
        [jnp.zeros_like(xp1[:, :, :1, :]), xp1[:, :, :-1, :]], axis=2)
    xc = jnp.concatenate([xp, xps], axis=1).reshape(
        N, 12 * Cin_p, S).astype(jnp.bfloat16)

    # Weights: (3, Cout, 9*Cin_p) bf16, chunk per kd, columns (kh, kw, cin).
    wpad = jnp.pad(weight, ((0, 0), (0, Cin_p - Cin), (0, 0), (0, 0), (0, 0)))
    w_all = jnp.transpose(wpad, (2, 0, 3, 4, 1)).reshape(
        3, Cout, 9 * Cin_p).astype(jnp.bfloat16)
    b2 = bias.reshape(Cout, 1).astype(jnp.float32)

    # ---- spatial tiling over output depth --------------------------------
    Td = _pick_tile_depth(Do, HoWo, max_tile_lanes)
    T = Do // Td
    Ts = Td * HoWo
    # TODO(synk): if a single output-depth row (Ho*Wo lanes) ever exceeds the
    # VMEM budget, additionally split the H axis (another halo-free phase dim).

    kernel = functools.partial(_conv_stats_kernel, cin_p=Cin_p, wo=Wo,
                               howo=HoWo)

    # Explicit scoped-VMEM budget (blocks double-buffered) + scheduler hint.
    est = (2 * (12 * Cin_p * Ts * 2 + 3 * Cout * 9 * Cin_p * 2 + Cout * Ts * 4)
           + 2 * 9 * Cin_p * Ts * 2 + 2 * Cout * Ts * 4 + (1 << 20))
    vmem_limit = int(min(64 << 20, max(16 << 20, 2 * est)))
    flops = 2 * N * S * Cout * 27 * Cin_p
    bytes_accessed = 2 * xc.size + 2 * w_all.size + 4 * (N * Cout * S)

    conv, tsum, tsq = pl.pallas_call(
        kernel,
        out_shape=(
            jax.ShapeDtypeStruct((N, Cout, S), jnp.float32),
            jax.ShapeDtypeStruct((N, T, Cout, 1), jnp.float32),
            jax.ShapeDtypeStruct((N, T, Cout, 1), jnp.float32),
        ),
        grid_spec=pltpu.PrefetchScalarGridSpec(
            num_scalar_prefetch=0,
            grid=(N, T),
            in_specs=[
                pl.BlockSpec((1, 12 * Cin_p, Ts), lambda n, t: (n, 0, t)),
                pl.BlockSpec((3, Cout, 9 * Cin_p), lambda n, t: (0, 0, 0)),
                pl.BlockSpec((Cout, 1), lambda n, t: (0, 0)),
            ],
            out_specs=[
                pl.BlockSpec((1, Cout, Ts), lambda n, t: (n, 0, t)),
                pl.BlockSpec((1, 1, Cout, 1), lambda n, t: (n, t, 0, 0)),
                pl.BlockSpec((1, 1, Cout, 1), lambda n, t: (n, t, 0, 0)),
            ],
            scratch_shapes=[pltpu.VMEM((2, 9 * Cin_p, Ts), jnp.bfloat16)],
        ),
        compiler_params=pltpu.CompilerParams(
            dimension_semantics=("parallel", "parallel"),
            vmem_limit_bytes=vmem_limit),
        cost_estimate=pl.CostEstimate(
            flops=int(flops), transcendentals=0,
            bytes_accessed=int(bytes_accessed)),
    )(xc, w_all, b2)

    # Finish InstanceNorm stats (tiny reduction over tiles) in plain JAX.
    mean = jnp.sum(tsum, axis=1) / S                          # (N, Cout, 1)
    var = jnp.sum(tsq, axis=1) / S - mean * mean
    rstd = lax.rsqrt(jnp.maximum(var, 0.0) + eps)

    # Second pass: normalize + LeakyReLU, in place over the conv output.
    out_flat = pl.pallas_call(
        functools.partial(_norm_act_kernel, slope=negative_slope),
        out_shape=jax.ShapeDtypeStruct((N, Cout, S), jnp.float32),
        grid_spec=pltpu.PrefetchScalarGridSpec(
            num_scalar_prefetch=0,
            grid=(N, T),
            in_specs=[
                pl.BlockSpec((1, Cout, Ts), lambda n, t: (n, 0, t)),
                pl.BlockSpec((1, Cout, 1), lambda n, t: (n, 0, 0)),
                pl.BlockSpec((1, Cout, 1), lambda n, t: (n, 0, 0)),
            ],
            out_specs=pl.BlockSpec((1, Cout, Ts), lambda n, t: (n, 0, t)),
        ),
        input_output_aliases={0: 0},
        compiler_params=pltpu.CompilerParams(
            dimension_semantics=("parallel", "parallel")),
    )(conv, mean, rstd)

    # Free (non-permuting) reshape back to PyTorch NCDHW.
    return out_flat.reshape(N, Cout, Do, Ho, Wo)


def _reference_forward(x, weight, bias, *, eps=1e-5, negative_slope=0.2):
    """Pure-JAX reference (lax conv + instance norm + leaky relu)."""
    y = lax.conv_general_dilated(
        x, weight, window_strides=(2, 2, 2),
        padding=((1, 1), (1, 1), (1, 1)),
        dimension_numbers=("NCDHW", "OIDHW", "NCDHW"))
    y = y + bias.reshape(1, -1, 1, 1, 1)
    mean = jnp.mean(y, axis=(2, 3, 4), keepdims=True)
    var = jnp.mean((y - mean) ** 2, axis=(2, 3, 4), keepdims=True)
    y = (y - mean) / jnp.sqrt(var + eps)
    return jnp.where(y >= 0.0, y, negative_slope * y)


if __name__ == "__main__":
    N, in_size, out_size = 2, 4, 8
    D = H = W = 16

    key = jax.random.PRNGKey(0)
    kx, kw, kb = jax.random.split(key, 3)
    x = jax.random.normal(kx, (N, in_size, D, H, W), dtype=jnp.float32)

    # Deterministic Conv3d-style init: weight (Cout, Cin, 3, 3, 3), bias (Cout,)
    fan_in = in_size * 27
    bound = 1.0 / (fan_in ** 0.5)
    weight = jax.random.uniform(kw, (out_size, in_size, 3, 3, 3),
                                minval=-bound, maxval=bound, dtype=jnp.float32)
    bias = jax.random.uniform(kb, (out_size,), minval=-bound, maxval=bound,
                              dtype=jnp.float32)

    # max_tile_lanes=256 forces 2 output-depth tiles at this small test size,
    # exercising the tiled two-pass InstanceNorm path.
    out = unet_down_forward(x, weight, bias, eps=1e-5, negative_slope=0.2,
                            max_tile_lanes=256)
    out = jax.block_until_ready(out)
    assert out.shape == (N, out_size, D // 2, H // 2, W // 2)

    ref = _reference_forward(x, weight, bias)
    # bf16 matmul operands (f32 accumulation) vs the XLA conv reference.
    assert jnp.allclose(out, ref, atol=3e-2, rtol=3e-2), "mismatch vs reference"

    print("KERNEL_OK")
</pallas_src>

<mosaic_0001>
module attributes {stable_mosaic.version = 11 : i64} {
  func.func @_conv_stats_kernel(%arg0: i32, %arg1: i32, %arg2: memref<1x96x256xbf16, #tpu.memory_space<vmem>>, %arg3: memref<3x8x72xbf16, #tpu.memory_space<vmem>>, %arg4: memref<8x1xf32, #tpu.memory_space<vmem>>, %arg5: memref<1x8x256xf32, #tpu.memory_space<vmem>>, %arg6: memref<1x1x8x1xf32, #tpu.memory_space<vmem>>, %arg7: memref<1x1x8x1xf32, #tpu.memory_space<vmem>>, %arg8: memref<2x72x256xbf16, #tpu.memory_space<vmem>>) attributes {dimension_semantics = [#tpu.dimension_semantics<parallel>, #tpu.dimension_semantics<parallel>], iteration_bounds = array<i64: 2, 2>, scalar_prefetch = 0 : i64, scratch_operands = 1 : i64, tpu.core_type = #tpu.core_type<tc>, window_params = [{transform_indices = @transform_0, window_bounds = array<i64: 1, 96, 256>}, {pipeline_mode = #tpu.pipeline_mode<synchronous>, transform_indices = @transform_1, window_bounds = array<i64: 3, 8, 72>}, {pipeline_mode = #tpu.pipeline_mode<synchronous>, transform_indices = @transform_2, window_bounds = array<i64: 8, 1>}, {transform_indices = @transform_3, window_bounds = array<i64: 1, 8, 256>}, {transform_indices = @transform_4, window_bounds = array<i64: 1, 1, 8, 1>}, {transform_indices = @transform_5, window_bounds = array<i64: 1, 1, 8, 1>}]} {
    %0 = tpu.iota {dimensions = array<i32: 1>} : vector<1x256xi32>
    %c64_i32 = arith.constant 64 : i32
    %c0_i32 = arith.constant 0 : i32
    %1 = arith.cmpi eq, %c64_i32, %c0_i32 : i32
    %c1_i32 = arith.constant 1 : i32
    %2 = arith.select %1, %c1_i32, %c64_i32 : i32
    %3 = vector.broadcast %2 : i32 to vector<1x256xi32>
    %4 = arith.remsi %0, %3 : vector<1x256xi32>
    %c0_i32_0 = arith.constant 0 : i32
    %5 = vector.broadcast %c0_i32_0 : i32 to vector<1x256xi32>
    %6 = arith.cmpi ne, %4, %5 : vector<1x256xi32>
    %c0_i32_1 = arith.constant 0 : i32
    %7 = vector.broadcast %c0_i32_1 : i32 to vector<1x256xi32>
    %8 = arith.cmpi slt, %4, %7 : vector<1x256xi32>
    %c0_i32_2 = arith.constant 0 : i32
    %9 = arith.cmpi slt, %2, %c0_i32_2 : i32
    %10 = vector.broadcast %9 : i1 to vector<1x256xi1>
    %11 = vector.broadcast %10 : vector<1x256xi1> to vector<1x256xi1>
    %12 = arith.xori %8, %11 : vector<1x256xi1>
    %13 = arith.andi %12, %6 : vector<1x256xi1>
    %14 = vector.broadcast %2 : i32 to vector<1x256xi32>
    %15 = arith.addi %4, %14 : vector<1x256xi32>
    %16 = arith.select %13, %15, %4 : vector<1x256xi1>, vector<1x256xi32>
    %c8_i32 = arith.constant 8 : i32
    %17 = vector.broadcast %c8_i32 : i32 to vector<1x256xi32>
    %18 = arith.cmpi sge, %16, %17 : vector<1x256xi32>
    %19 = arith.extui %18 : vector<1x256xi1> to vector<1x256xi32>
    %20 = arith.sitofp %19 : vector<1x256xi32> to vector<1x256xf32>
    %21 = arith.truncf %20 : vector<1x256xf32> to vector<1x256xbf16>
    %c8_i32_3 = arith.constant 8 : i32
    %c0_i32_4 = arith.constant 0 : i32
    %22 = arith.cmpi eq, %c8_i32_3, %c0_i32_4 : i32
    %c1_i32_5 = arith.constant 1 : i32
    %23 = arith.select %22, %c1_i32_5, %c8_i32_3 : i32
    %24 = vector.broadcast %23 : i32 to vector<1x256xi32>
    %25 = arith.remsi %0, %24 : vector<1x256xi32>
    %c0_i32_6 = arith.constant 0 : i32
    %26 = vector.broadcast %c0_i32_6 : i32 to vector<1x256xi32>
    %27 = arith.cmpi ne, %25, %26 : vector<1x256xi32>
    %c0_i32_7 = arith.constant 0 : i32
    %28 = vector.broadcast %c0_i32_7 : i32 to vector<1x256xi32>
    %29 = arith.cmpi slt, %25, %28 : vector<1x256xi32>
    %c0_i32_8 = arith.constant 0 : i32
    %30 = arith.cmpi slt, %23, %c0_i32_8 : i32
    %31 = vector.broadcast %30 : i1 to vector<1x256xi1>
    %32 = vector.broadcast %31 : vector<1x256xi1> to vector<1x256xi1>
    %33 = arith.xori %29, %32 : vector<1x256xi1>
    %34 = arith.andi %33, %27 : vector<1x256xi1>
    %35 = vector.broadcast %23 : i32 to vector<1x256xi32>
    %36 = arith.addi %25, %35 : vector<1x256xi32>
    %37 = arith.select %34, %36, %25 : vector<1x256xi1>, vector<1x256xi32>
    %c0_i32_9 = arith.constant 0 : i32
    %38 = vector.broadcast %c0_i32_9 : i32 to vector<1x256xi32>
    %39 = arith.cmpi ne, %37, %38 : vector<1x256xi32>
    %40 = arith.extui %39 : vector<1x256xi1> to vector<1x256xi32>
    %41 = arith.sitofp %40 : vector<1x256xi32> to vector<1x256xf32>
    %42 = arith.truncf %41 : vector<1x256xf32> to vector<1x256xbf16>
    %43 = arith.mulf %21, %42 : vector<1x256xbf16>
    %c0 = arith.constant 0 : index
    %c88 = arith.constant 88 : index
    %c0_10 = arith.constant 0 : index
    %44 = vector.load %arg2[%c0, %c88, %c0_10] : memref<1x96x256xbf16, #tpu.memory_space<vmem>>, vector<1x8x256xbf16>
    %45 = vector.shape_cast %44 : vector<1x8x256xbf16> to vector<8x256xbf16>
    %46 = vector.extract_strided_slice %45 {offsets = [0, 0], sizes = [8, 247], strides = [1, 1]} : vector<8x256xbf16> to vector<8x247xbf16>
    %47 = vector.extract_strided_slice %43 {offsets = [0, 9], sizes = [1, 247], strides = [1, 1]} : vector<1x256xbf16> to vector<1x247xbf16>
    %48 = vector.broadcast %47 : vector<1x247xbf16> to vector<8x247xbf16>
    %49 = arith.mulf %46, %48 : vector<8x247xbf16>
    %cst = arith.constant 0.000000e+00 : bf16
    %50 = vector.broadcast %cst : bf16 to vector<8x9xbf16>
    %c0_11 = arith.constant 0 : index
    %c0_12 = arith.constant 0 : index
    %c0_13 = arith.constant 0 : index
    %51 = vector.load %arg8[%c0_11, %c0_12, %c0_13] : memref<2x72x256xbf16, #tpu.memory_space<vmem>>, vector<1x8x9xbf16>
    %52 = vector.shape_cast %51 : vector<1x8x9xbf16> to vector<8x9xbf16>
    %53 = vector.shape_cast %50 : vector<8x9xbf16> to vector<1x8x9xbf16>
    tpu.vector_store %arg8[%c0_11, %c0_12, %c0_13], %53 {strides = array<i32>} : memref<2x72x256xbf16, #tpu.memory_space<vmem>>, vector<1x8x9xbf16>,
    %c0_14 = arith.constant 0 : index
    %c0_15 = arith.constant 0 : index
    %c9 = arith.constant 9 : index
    %54 = vector.load %arg8[%c0_14, %c0_15, %c9] : memref<2x72x256xbf16, #tpu.memory_space<vmem>>, vector<1x8x247xbf16>
    %55 = vector.shape_cast %54 : vector<1x8x247xbf16> to vector<8x247xbf16>
    %56 = vector.shape_cast %49 : vector<8x247xbf16> to vector<1x8x247xbf16>
    tpu.vector_store %arg8[%c0_14, %c0_15, %c9], %56 {strides = array<i32>} : memref<2x72x256xbf16, #tpu.memory_space<vmem>>, vector<1x8x247xbf16>,
    %c0_16 = arith.constant 0 : index
    %c80 = arith.constant 80 : index
    %c0_17 = arith.constant 0 : index
    %57 = vector.load %arg2[%c0_16, %c80, %c0_17] : memref<1x96x256xbf16, #tpu.memory_space<vmem>>, vector<1x8x256xbf16>
    %58 = vector.shape_cast %57 : vector<1x8x256xbf16> to vector<8x256xbf16>
    %59 = vector.extract_strided_slice %58 {offsets = [0, 0], sizes = [8, 248], strides = [1, 1]} : vector<8x256xbf16> to vector<8x248xbf16>
    %60 = vector.extract_strided_slice %21 {offsets = [0, 8], sizes = [1, 248], strides = [1, 1]} : vector<1x256xbf16> to vector<1x248xbf16>
    %61 = vector.broadcast %60 : vector<1x248xbf16> to vector<8x248xbf16>
    %62 = arith.mulf %59, %61 : vector<8x248xbf16>
    %cst_18 = arith.constant 0.000000e+00 : bf16
    %63 = vector.broadcast %cst_18 : bf16 to vector<8x8xbf16>
    %c0_19 = arith.constant 0 : index
    %c8 = arith.constant 8 : index
    %c0_20 = arith.constant 0 : index
    %64 = vector.load %arg8[%c0_19, %c8, %c0_20] : memref<2x72x256xbf16, #tpu.memory_space<vmem>>, vector<1x8x8xbf16>
    %65 = vector.shape_cast %64 : vector<1x8x8xbf16> to vector<8x8xbf16>
    %66 = vector.shape_cast %63 : vector<8x8xbf16> to vector<1x8x8xbf16>
    tpu.vector_store %arg8[%c0_19, %c8, %c0_20], %66 {strides = array<i32>} : memref<2x72x256xbf16, #tpu.memory_space<vmem>>, vector<1x8x8xbf16>,
    %c0_21 = arith.constant 0 : index
    %c8_22 = arith.constant 8 : index
    %c8_23 = arith.constant 8 : index
    %67 = vector.load %arg8[%c0_21, %c8_22, %c8_23] : memref<2x72x256xbf16, #tpu.memory_space<vmem>>, vector<1x8x248xbf16>
    %68 = vector.shape_cast %67 : vector<1x8x248xbf16> to vector<8x248xbf16>
    %69 = vector.shape_cast %62 : vector<8x248xbf16> to vector<1x8x248xbf16>
    tpu.vector_store %arg8[%c0_21, %c8_22, %c8_23], %69 {strides = array<i32>} : memref<2x72x256xbf16, #tpu.memory_space<vmem>>, vector<1x8x248xbf16>,
    %c0_24 = arith.constant 0 : index
    %c88_25 = arith.constant 88 : index
    %c0_26 = arith.constant 0 : index
    %70 = vector.load %arg2[%c0_24, %c88_25, %c0_26] : memref<1x96x256xbf16, #tpu.memory_space<vmem>>, vector<1x8x256xbf16>
    %71 = vector.shape_cast %70 : vector<1x8x256xbf16> to vector<8x256xbf16>
    %72 = vector.extract_strided_slice %71 {offsets = [0, 0], sizes = [8, 248], strides = [1, 1]} : vector<8x256xbf16> to vector<8x248xbf16>
    %73 = vector.extract_strided_slice %21 {offsets = [0, 8], sizes = [1, 248], strides = [1, 1]} : vector<1x256xbf16> to vector<1x248xbf16>
    %74 = vector.broadcast %73 : vector<1x248xbf16> to vector<8x248xbf16>
    %75 = arith.mulf %72, %74 : vector<8x248xbf16>
    %cst_27 = arith.constant 0.000000e+00 : bf16
    %76 = vector.broadcast %cst_27 : bf16 to vector<8x8xbf16>
    %c0_28 = arith.constant 0 : index
    %c16 = arith.constant 16 : index
    %c0_29 = arith.constant 0 : index
    %77 = vector.load %arg8[%c0_28, %c16, %c0_29] : memref<2x72x256xbf16, #tpu.memory_space<vmem>>, vector<1x8x8xbf16>
    %78 = vector.shape_cast %77 : vector<1x8x8xbf16> to vector<8x8xbf16>
    %79 = vector.shape_cast %76 : vector<8x8xbf16> to vector<1x8x8xbf16>
    tpu.vector_store %arg8[%c0_28, %c16, %c0_29], %79 {strides = array<i32>} : memref<2x72x256xbf16, #tpu.memory_space<vmem>>, vector<1x8x8xbf16>,
    %c0_30 = arith.constant 0 : index
    %c16_31 = arith.constant 16 : index
    %c8_32 = arith.constant 8 : index
    %80 = vector.load %arg8[%c0_30, %c16_31, %c8_32] : memref<2x72x256xbf16, #tpu.memory_space<vmem>>, vector<1x8x248xbf16>
    %81 = vector.shape_cast %80 : vector<1x8x248xbf16> to vector<8x248xbf16>
    %82 = vector.shape_cast %75 : vector<8x248xbf16> to vector<1x8x248xbf16>
    tpu.vector_store %arg8[%c0_30, %c16_31, %c8_32], %82 {strides = array<i32>} : memref<2x72x256xbf16, #tpu.memory_space<vmem>>, vector<1x8x248xbf16>,
    %c0_33 = arith.constant 0 : index
    %c72 = arith.constant 72 : index
    %c0_34 = arith.constant 0 : index
    %83 = vector.load %arg2[%c0_33, %c72, %c0_34] : memref<1x96x256xbf16, #tpu.memory_space<vmem>>, vector<1x8x256xbf16>
    %84 = vector.shape_cast %83 : vector<1x8x256xbf16> to vector<8x256xbf16>
    %85 = vector.extract_strided_slice %84 {offsets = [0, 0], sizes = [8, 255], strides = [1, 1]} : vector<8x256xbf16> to vector<8x255xbf16>
    %86 = vector.extract_strided_slice %42 {offsets = [0, 1], sizes = [1, 255], strides = [1, 1]} : vector<1x256xbf16> to vector<1x255xbf16>
    %87 = vector.broadcast %86 : vector<1x255xbf16> to vector<8x255xbf16>
    %88 = arith.mulf %85, %87 : vector<8x255xbf16>
    %cst_35 = arith.constant 0.000000e+00 : bf16
    %89 = vector.broadcast %cst_35 : bf16 to vector<8x1xbf16>
    %c0_36 = arith.constant 0 : index
    %c24 = arith.constant 24 : index
    %c0_37 = arith.constant 0 : index
    %90 = vector.load %arg8[%c0_36, %c24, %c0_37] : memref<2x72x256xbf16, #tpu.memory_space<vmem>>, vector<1x8x1xbf16>
    %91 = vector.shape_cast %90 : vector<1x8x1xbf16> to vector<8x1xbf16>
    %92 = vector.shape_cast %89 : vector<8x1xbf16> to vector<1x8x1xbf16>
    tpu.vector_store %arg8[%c0_36, %c24, %c0_37], %92 {strides = array<i32>} : memref<2x72x256xbf16, #tpu.memory_space<vmem>>, vector<1x8x1xbf16>,
    %c0_38 = arith.constant 0 : index
    %c24_39 = arith.constant 24 : index
    %c1 = arith.constant 1 : index
    %93 = vector.load %arg8[%c0_38, %c24_39, %c1] : memref<2x72x256xbf16, #tpu.memory_space<vmem>>, vector<1x8x255xbf16>
    %94 = vector.shape_cast %93 : vector<1x8x255xbf16> to vector<8x255xbf16>
    %95 = vector.shape_cast %88 : vector<8x255xbf16> to vector<1x8x255xbf16>
    tpu.vector_store %arg8[%c0_38, %c24_39, %c1], %95 {strides = array<i32>} : memref<2x72x256xbf16, #tpu.memory_space<vmem>>, vector<1x8x255xbf16>,
    %c0_40 = arith.constant 0 : index
    %c64 = arith.constant 64 : index
    %c0_41 = arith.constant 0 : index
    %96 = vector.load %arg2[%c0_40, %c64, %c0_41] : memref<1x96x256xbf16, #tpu.memory_space<vmem>>, vector<1x8x256xbf16>
    %97 = vector.shape_cast %96 : vector<1x8x256xbf16> to vector<8x256xbf16>
    %c0_42 = arith.constant 0 : index
    %c32 = arith.constant 32 : index
    %c0_43 = arith.constant 0 : index
    %98 = vector.load %arg8[%c0_42, %c32, %c0_43] : memref<2x72x256xbf16, #tpu.memory_space<vmem>>, vector<1x8x256xbf16>
    %99 = vector.shape_cast %98 : vector<1x8x256xbf16> to vector<8x256xbf16>
    %100 = vector.shape_cast %97 : vector<8x256xbf16> to vector<1x8x256xbf16>
    tpu.vector_store %arg8[%c0_42, %c32, %c0_43], %100 {strides = array<i32>} : memref<2x72x256xbf16, #tpu.memory_space<vmem>>, vector<1x8x256xbf16>,
    %c0_44 = arith.constant 0 : index
    %c72_45 = arith.constant 72 : index
    %c0_46 = arith.constant 0 : index
    %101 = vector.load %arg2[%c0_44, %c72_45, %c0_46] : memref<1x96x256xbf16, #tpu.memory_space<vmem>>, vector<1x8x256xbf16>
    %102 = vector.shape_cast %101 : vector<1x8x256xbf16> to vector<8x256xbf16>
    %c0_47 = arith.constant 0 : index
    %c40 = arith.constant 40 : index
    %c0_48 = arith.constant 0 : index
    %103 = vector.load %arg8[%c0_47, %c40, %c0_48] : memref<2x72x256xbf16, #tpu.memory_space<vmem>>, vector<1x8x256xbf16>
    %104 = vector.shape_cast %103 : vector<1x8x256xbf16> to vector<8x256xbf16>
    %105 = vector.shape_cast %102 : vector<8x256xbf16> to vector<1x8x256xbf16>
    tpu.vector_store %arg8[%c0_47, %c40, %c0_48], %105 {strides = array<i32>} : memref<2x72x256xbf16, #tpu.memory_space<vmem>>, vector<1x8x256xbf16>,
    %c0_49 = arith.constant 0 : index
    %c88_50 = arith.constant 88 : index
    %c0_51 = arith.constant 0 : index
    %106 = vector.load %arg2[%c0_49, %c88_50, %c0_51] : memref<1x96x256xbf16, #tpu.memory_space<vmem>>, vector<1x8x256xbf16>
    %107 = vector.shape_cast %106 : vector<1x8x256xbf16> to vector<8x256xbf16>
    %108 = vector.extract_strided_slice %107 {offsets = [0, 0], sizes = [8, 255], strides = [1, 1]} : vector<8x256xbf16> to vector<8x255xbf16>
    %109 = vector.extract_strided_slice %42 {offsets = [0, 1], sizes = [1, 255], strides = [1, 1]} : vector<1x256xbf16> to vector<1x255xbf16>
    %110 = vector.broadcast %109 : vector<1x255xbf16> to vector<8x255xbf16>
    %111 = arith.mulf %108, %110 : vector<8x255xbf16>
    %cst_52 = arith.constant 0.000000e+00 : bf16
    %112 = vector.broadcast %cst_52 : bf16 to vector<8x1xbf16>
    %c0_53 = arith.constant 0 : index
    %c48 = arith.constant 48 : index
    %c0_54 = arith.constant 0 : index
    %113 = vector.load %arg8[%c0_53, %c48, %c0_54] : memref<2x72x256xbf16, #tpu.memory_space<vmem>>, vector<1x8x1xbf16>
    %114 = vector.shape_cast %113 : vector<1x8x1xbf16> to vector<8x1xbf16>
    %115 = vector.shape_cast %112 : vector<8x1xbf16> to vector<1x8x1xbf16>
    tpu.vector_store %arg8[%c0_53, %c48, %c0_54], %115 {strides = array<i32>} : memref<2x72x256xbf16, #tpu.memory_space<vmem>>, vector<1x8x1xbf16>,
    %c0_55 = arith.constant 0 : index
    %c48_56 = arith.constant 48 : index
    %c1_57 = arith.constant 1 : index
    %116 = vector.load %arg8[%c0_55, %c48_56, %c1_57] : memref<2x72x256xbf16, #tpu.memory_space<vmem>>, vector<1x8x255xbf16>
    %117 = vector.shape_cast %116 : vector<1x8x255xbf16> to vector<8x255xbf16>
    %118 = vector.shape_cast %111 : vector<8x255xbf16> to vector<1x8x255xbf16>
    tpu.vector_store %arg8[%c0_55, %c48_56, %c1_57], %118 {strides = array<i32>} : memref<2x72x256xbf16, #tpu.memory_space<vmem>>, vector<1x8x255xbf16>,
    %c0_58 = arith.constant 0 : index
    %c80_59 = arith.constant 80 : index
    %c0_60 = arith.constant 0 : index
    %119 = vector.load %arg2[%c0_58, %c80_59, %c0_60] : memref<1x96x256xbf16, #tpu.memory_space<vmem>>, vector<1x8x256xbf16>
    %120 = vector.shape_cast %119 : vector<1x8x256xbf16> to vector<8x256xbf16>
    %c0_61 = arith.constant 0 : index
    %c56 = arith.constant 56 : index
    %c0_62 = arith.constant 0 : index
    %121 = vector.load %arg8[%c0_61, %c56, %c0_62] : memref<2x72x256xbf16, #tpu.memory_space<vmem>>, vector<1x8x256xbf16>
    %122 = vector.shape_cast %121 : vector<1x8x256xbf16> to vector<8x256xbf16>
    %123 = vector.shape_cast %120 : vector<8x256xbf16> to vector<1x8x256xbf16>
    tpu.vector_store %arg8[%c0_61, %c56, %c0_62], %123 {strides = array<i32>} : memref<2x72x256xbf16, #tpu.memory_space<vmem>>, vector<1x8x256xbf16>,
    %c0_63 = arith.constant 0 : index
    %c88_64 = arith.constant 88 : index
    %c0_65 = arith.constant 0 : index
    %124 = vector.load %arg2[%c0_63, %c88_64, %c0_65] : memref<1x96x256xbf16, #tpu.memory_space<vmem>>, vector<1x8x256xbf16>
    %125 = vector.shape_cast %124 : vector<1x8x256xbf16> to vector<8x256xbf16>
    %c0_66 = arith.constant 0 : index
    %c64_67 = arith.constant 64 : index
    %c0_68 = arith.constant 0 : index
    %126 = vector.load %arg8[%c0_66, %c64_67, %c0_68] : memref<2x72x256xbf16, #tpu.memory_space<vmem>>, vector<1x8x256xbf16>
    %127 = vector.shape_cast %126 : vector<1x8x256xbf16> to vector<8x256xbf16>
    %128 = vector.shape_cast %125 : vector<8x256xbf16> to vector<1x8x256xbf16>
    tpu.vector_store %arg8[%c0_66, %c64_67, %c0_68], %128 {strides = array<i32>} : memref<2x72x256xbf16, #tpu.memory_space<vmem>>, vector<1x8x256xbf16>,
    %c0_69 = arith.constant 0 : index
    %c0_70 = arith.constant 0 : index
    %c0_71 = arith.constant 0 : index
    %129 = vector.load %arg3[%c0_69, %c0_70, %c0_71] : memref<3x8x72xbf16, #tpu.memory_space<vmem>>, vector<1x8x72xbf16>
    %130 = vector.shape_cast %129 : vector<1x8x72xbf16> to vector<8x72xbf16>
    %c0_72 = arith.constant 0 : index
    %c0_73 = arith.constant 0 : index
    %c0_74 = arith.constant 0 : index
    %131 = vector.load %arg8[%c0_72, %c0_73, %c0_74] : memref<2x72x256xbf16, #tpu.memory_space<vmem>>, vector<1x72x256xbf16>
    %132 = vector.shape_cast %131 : vector<1x72x256xbf16> to vector<72x256xbf16>
    %cst_75 = arith.constant dense<0.000000e+00> : vector<8x256xf32>
    %133 = tpu.matmul %130, %132, %cst_75 {dimension_numbers = #tpu.dot_dimension_numbers<[1], [0], [0], [1], [0, 0, 1, 1], [], []>} : vector<8x72xbf16>, vector<72x256xbf16>, vector<8x256xf32> -> vector<8x256xf32>
    %c0_76 = arith.constant 0 : index
    %c24_77 = arith.constant 24 : index
    %c0_78 = arith.constant 0 : index
    %134 = vector.load %arg2[%c0_76, %c24_77, %c0_78] : memref<1x96x256xbf16, #tpu.memory_space<vmem>>, vector<1x8x256xbf16>
    %135 = vector.shape_cast %134 : vector<1x8x256xbf16> to vector<8x256xbf16>
    %136 = vector.extract_strided_slice %135 {offsets = [0, 0], sizes = [8, 247], strides = [1, 1]} : vector<8x256xbf16> to vector<8x247xbf16>
    %137 = vector.extract_strided_slice %43 {offsets = [0, 9], sizes = [1, 247], strides = [1, 1]} : vector<1x256xbf16> to vector<1x247xbf16>
    %138 = vector.broadcast %137 : vector<1x247xbf16> to vector<8x247xbf16>
    %139 = arith.mulf %136, %138 : vector<8x247xbf16>
    %cst_79 = arith.constant 0.000000e+00 : bf16
    %140 = vector.broadcast %cst_79 : bf16 to vector<8x9xbf16>
    %c1_80 = arith.constant 1 : index
    %c0_81 = arith.constant 0 : index
    %c0_82 = arith.constant 0 : index
    %141 = vector.load %arg8[%c1_80, %c0_81, %c0_82] : memref<2x72x256xbf16, #tpu.memory_space<vmem>>, vector<1x8x9xbf16>
    %142 = vector.shape_cast %141 : vector<1x8x9xbf16> to vector<8x9xbf16>
    %143 = vector.shape_cast %140 : vector<8x9xbf16> to vector<1x8x9xbf16>
    tpu.vector_store %arg8[%c1_80, %c0_81, %c0_82], %143 {strides = array<i32>} : memref<2x72x256xbf16, #tpu.memory_space<vmem>>, vector<1x8x9xbf16>,
    %c1_83 = arith.constant 1 : index
    %c0_84 = arith.constant 0 : index
    %c9_85 = arith.constant 9 : index
    %144 = vector.load %arg8[%c1_83, %c0_84, %c9_85] : memref<2x72x256xbf16, #tpu.memory_space<vmem>>, vector<1x8x247xbf16>
    %145 = vector.shape_cast %144 : vector<1x8x247xbf16> to vector<8x247xbf16>
    %146 = vector.shape_cast %139 : vector<8x247xbf16> to vector<1x8x247xbf16>
    tpu.vector_store %arg8[%c1_83, %c0_84, %c9_85], %146 {strides = array<i32>} : memref<2x72x256xbf16, #tpu.memory_space<vmem>>, vector<1x8x247xbf16>,
    %c0_86 = arith.constant 0 : index
    %c16_87 = arith.constant 16 : index
    %c0_88 = arith.constant 0 : index
    %147 = vector.load %arg2[%c0_86, %c16_87, %c0_88] : memref<1x96x256xbf16, #tpu.memory_space<vmem>>, vector<1x8x256xbf16>
    %148 = vector.shape_cast %147 : vector<1x8x256xbf16> to vector<8x256xbf16>
    %149 = vector.extract_strided_slice %148 {offsets = [0, 0], sizes = [8, 248], strides = [1, 1]} : vector<8x256xbf16> to vector<8x248xbf16>
    %150 = vector.extract_strided_slice %21 {offsets = [0, 8], sizes = [1, 248], strides = [1, 1]} : vector<1x256xbf16> to vector<1x248xbf16>
    %151 = vector.broadcast %150 : vector<1x248xbf16> to vector<8x248xbf16>
    %152 = arith.mulf %149, %151 : vector<8x248xbf16>
    %cst_89 = arith.constant 0.000000e+00 : bf16
    %153 = vector.broadcast %cst_89 : bf16 to vector<8x8xbf16>
    %c1_90 = arith.constant 1 : index
    %c8_91 = arith.constant 8 : index
    %c0_92 = arith.constant 0 : index
    %154 = vector.load %arg8[%c1_90, %c8_91, %c0_92] : memref<2x72x256xbf16, #tpu.memory_space<vmem>>, vector<1x8x8xbf16>
    %155 = vector.shape_cast %154 : vector<1x8x8xbf16> to vector<8x8xbf16>
    %156 = vector.shape_cast %153 : vector<8x8xbf16> to vector<1x8x8xbf16>
    tpu.vector_store %arg8[%c1_90, %c8_91, %c0_92], %156 {strides = array<i32>} : memref<2x72x256xbf16, #tpu.memory_space<vmem>>, vector<1x8x8xbf16>,
    %c1_93 = arith.constant 1 : index
    %c8_94 = arith.constant 8 : index
    %c8_95 = arith.constant 8 : index
    %157 = vector.load %arg8[%c1_93, %c8_94, %c8_95] : memref<2x72x256xbf16, #tpu.memory_space<vmem>>, vector<1x8x248xbf16>
    %158 = vector.shape_cast %157 : vector<1x8x248xbf16> to vector<8x248xbf16>
    %159 = vector.shape_cast %152 : vector<8x248xbf16> to vector<1x8x248xbf16>
    tpu.vector_store %arg8[%c1_93, %c8_94, %c8_95], %159 {strides = array<i32>} : memref<2x72x256xbf16, #tpu.memory_space<vmem>>, vector<1x8x248xbf16>,
    %c0_96 = arith.constant 0 : index
    %c24_97 = arith.constant 24 : index
    %c0_98 = arith.constant 0 : index
    %160 = vector.load %arg2[%c0_96, %c24_97, %c0_98] : memref<1x96x256xbf16, #tpu.memory_space<vmem>>, vector<1x8x256xbf16>
    %161 = vector.shape_cast %160 : vector<1x8x256xbf16> to vector<8x256xbf16>
    %162 = vector.extract_strided_slice %161 {offsets = [0, 0], sizes = [8, 248], strides = [1, 1]} : vector<8x256xbf16> to vector<8x248xbf16>
    %163 = vector.extract_strided_slice %21 {offsets = [0, 8], sizes = [1, 248], strides = [1, 1]} : vector<1x256xbf16> to vector<1x248xbf16>
    %164 = vector.broadcast %163 : vector<1x248xbf16> to vector<8x248xbf16>
    %165 = arith.mulf %162, %164 : vector<8x248xbf16>
    %cst_99 = arith.constant 0.000000e+00 : bf16
    %166 = vector.broadcast %cst_99 : bf16 to vector<8x8xbf16>
    %c1_100 = arith.constant 1 : index
    %c16_101 = arith.constant 16 : index
    %c0_102 = arith.constant 0 : index
    %167 = vector.load %arg8[%c1_100, %c16_101, %c0_102] : memref<2x72x256xbf16, #tpu.memory_space<vmem>>, vector<1x8x8xbf16>
    %168 = vector.shape_cast %167 : vector<1x8x8xbf16> to vector<8x8xbf16>
    %169 = vector.shape_cast %166 : vector<8x8xbf16> to vector<1x8x8xbf16>
    tpu.vector_store %arg8[%c1_100, %c16_101, %c0_102], %169 {strides = array<i32>} : memref<2x72x256xbf16, #tpu.memory_space<vmem>>, vector<1x8x8xbf16>,
    %c1_103 = arith.constant 1 : index
    %c16_104 = arith.constant 16 : index
    %c8_105 = arith.constant 8 : index
    %170 = vector.load %arg8[%c1_103, %c16_104, %c8_105] : memref<2x72x256xbf16, #tpu.memory_space<vmem>>, vector<1x8x248xbf16>
    %171 = vector.shape_cast %170 : vector<1x8x248xbf16> to vector<8x248xbf16>
    %172 = vector.shape_cast %165 : vector<8x248xbf16> to vector<1x8x248xbf16>
    tpu.vector_store %arg8[%c1_103, %c16_104, %c8_105], %172 {strides = array<i32>} : memref<2x72x256xbf16, #tpu.memory_space<vmem>>, vector<1x8x248xbf16>,
    %c0_106 = arith.constant 0 : index
    %c8_107 = arith.constant 8 : index
    %c0_108 = arith.constant 0 : index
    %173 = vector.load %arg2[%c0_106, %c8_107, %c0_108] : memref<1x96x256xbf16, #tpu.memory_space<vmem>>, vector<1x8x256xbf16>
    %174 = vector.shape_cast %173 : vector<1x8x256xbf16> to vector<8x256xbf16>
    %175 = vector.extract_strided_slice %174 {offsets = [0, 0], sizes = [8, 255], strides = [1, 1]} : vector<8x256xbf16> to vector<8x255xbf16>
    %176 = vector.extract_strided_slice %42 {offsets = [0, 1], sizes = [1, 255], strides = [1, 1]} : vector<1x256xbf16> to vector<1x255xbf16>
    %177 = vector.broadcast %176 : vector<1x255xbf16> to vector<8x255xbf16>
    %178 = arith.mulf %175, %177 : vector<8x255xbf16>
    %cst_109 = arith.constant 0.000000e+00 : bf16
    %179 = vector.broadcast %cst_109 : bf16 to vector<8x1xbf16>
    %c1_110 = arith.constant 1 : index
    %c24_111 = arith.constant 24 : index
    %c0_112 = arith.constant 0 : index
    %180 = vector.load %arg8[%c1_110, %c24_111, %c0_112] : memref<2x72x256xbf16, #tpu.memory_space<vmem>>, vector<1x8x1xbf16>
    %181 = vector.shape_cast %180 : vector<1x8x1xbf16> to vector<8x1xbf16>
    %182 = vector.shape_cast %179 : vector<8x1xbf16> to vector<1x8x1xbf16>
    tpu.vector_store %arg8[%c1_110, %c24_111, %c0_112], %182 {strides = array<i32>} : memref<2x72x256xbf16, #tpu.memory_space<vmem>>, vector<1x8x1xbf16>,
    %c1_113 = arith.constant 1 : index
    %c24_114 = arith.constant 24 : index
    %c1_115 = arith.constant 1 : index
    %183 = vector.load %arg8[%c1_113, %c24_114, %c1_115] : memref<2x72x256xbf16, #tpu.memory_space<vmem>>, vector<1x8x255xbf16>
    %184 = vector.shape_cast %183 : vector<1x8x255xbf16> to vector<8x255xbf16>
    %185 = vector.shape_cast %178 : vector<8x255xbf16> to vector<1x8x255xbf16>
    tpu.vector_store %arg8[%c1_113, %c24_114, %c1_115], %185 {strides = array<i32>} : memref<2x72x256xbf16, #tpu.memory_space<vmem>>, vector<1x8x255xbf16>,
    %c0_116 = arith.constant 0 : index
    %c0_117 = arith.constant 0 : index
    %c0_118 = arith.constant 0 : index
    %186 = vector.load %arg2[%c0_116, %c0_117, %c0_118] : memref<1x96x256xbf16, #tpu.memory_space<vmem>>, vector<1x8x256xbf16>
    %187 = vector.shape_cast %186 : vector<1x8x256xbf16> to vector<8x256xbf16>
    %c1_119 = arith.constant 1 : index
    %c32_120 = arith.constant 32 : index
    %c0_121 = arith.constant 0 : index
    %188 = vector.load %arg8[%c1_119, %c32_120, %c0_121] : memref<2x72x256xbf16, #tpu.memory_space<vmem>>, vector<1x8x256xbf16>
    %189 = vector.shape_cast %188 : vector<1x8x256xbf16> to vector<8x256xbf16>
    %190 = vector.shape_cast %187 : vector<8x256xbf16> to vector<1x8x256xbf16>
    tpu.vector_store %arg8[%c1_119, %c32_120, %c0_121], %190 {strides = array<i32>} : memref<2x72x256xbf16, #tpu.memory_space<vmem>>, vector<1x8x256xbf16>,
    %c0_122 = arith.constant 0 : index
    %c8_123 = arith.constant 8 : index
    %c0_124 = arith.constant 0 : index
    %191 = vector.load %arg2[%c0_122, %c8_123, %c0_124] : memref<1x96x256xbf16, #tpu.memory_space<vmem>>, vector<1x8x256xbf16>
    %192 = vector.shape_cast %191 : vector<1x8x256xbf16> to vector<8x256xbf16>
    %c1_125 = arith.constant 1 : index
    %c40_126 = arith.constant 40 : index
    %c0_127 = arith.constant 0 : index
    %193 = vector.load %arg8[%c1_125, %c40_126, %c0_127] : memref<2x72x256xbf16, #tpu.memory_space<vmem>>, vector<1x8x256xbf16>
    %194 = vector.shape_cast %193 : vector<1x8x256xbf16> to vector<8x256xbf16>
    %195 = vector.shape_cast %192 : vector<8x256xbf16> to vector<1x8x256xbf16>
    tpu.vector_store %arg8[%c1_125, %c40_126, %c0_127], %195 {strides = array<i32>} : memref<2x72x256xbf16, #tpu.memory_space<vmem>>, vector<1x8x256xbf16>,
    %c0_128 = arith.constant 0 : index
    %c24_129 = arith.constant 24 : index
    %c0_130 = arith.constant 0 : index
    %196 = vector.load %arg2[%c0_128, %c24_129, %c0_130] : memref<1x96x256xbf16, #tpu.memory_space<vmem>>, vector<1x8x256xbf16>
    %197 = vector.shape_cast %196 : vector<1x8x256xbf16> to vector<8x256xbf16>
    %198 = vector.extract_strided_slice %197 {offsets = [0, 0], sizes = [8, 255], strides = [1, 1]} : vector<8x256xbf16> to vector<8x255xbf16>
    %199 = vector.extract_strided_slice %42 {offsets = [0, 1], sizes = [1, 255], strides = [1, 1]} : vector<1x256xbf16> to vector<1x255xbf16>
    %200 = vector.broadcast %199 : vector<1x255xbf16> to vector<8x255xbf16>
    %201 = arith.mulf %198, %200 : vector<8x255xbf16>
    %cst_131 = arith.constant 0.000000e+00 : bf16
    %202 = vector.broadcast %cst_131 : bf16 to vector<8x1xbf16>
    %c1_132 = arith.constant 1 : index
    %c48_133 = arith.constant 48 : index
    %c0_134 = arith.constant 0 : index
    %203 = vector.load %arg8[%c1_132, %c48_133, %c0_134] : memref<2x72x256xbf16, #tpu.memory_space<vmem>>, vector<1x8x1xbf16>
    %204 = vector.shape_cast %203 : vector<1x8x1xbf16> to vector<8x1xbf16>
    %205 = vector.shape_cast %202 : vector<8x1xbf16> to vector<1x8x1xbf16>
    tpu.vector_store %arg8[%c1_132, %c48_133, %c0_134], %205 {strides = array<i32>} : memref<2x72x256xbf16, #tpu.memory_space<vmem>>, vector<1x8x1xbf16>,
    %c1_135 = arith.constant 1 : index
    %c48_136 = arith.constant 48 : index
    %c1_137 = arith.constant 1 : index
    %206 = vector.load %arg8[%c1_135, %c48_136, %c1_137] : memref<2x72x256xbf16, #tpu.memory_space<vmem>>, vector<1x8x255xbf16>
    %207 = vector.shape_cast %206 : vector<1x8x255xbf16> to vector<8x255xbf16>
    %208 = vector.shape_cast %201 : vector<8x255xbf16> to vector<1x8x255xbf16>
    tpu.vector_store %arg8[%c1_135, %c48_136, %c1_137], %208 {strides = array<i32>} : memref<2x72x256xbf16, #tpu.memory_space<vmem>>, vector<1x8x255xbf16>,
    %c0_138 = arith.constant 0 : index
    %c16_139 = arith.constant 16 : index
    %c0_140 = arith.constant 0 : index
    %209 = vector.load %arg2[%c0_138, %c16_139, %c0_140] : memref<1x96x256xbf16, #tpu.memory_space<vmem>>, vector<1x8x256xbf16>
    %210 = vector.shape_cast %209 : vector<1x8x256xbf16> to vector<8x256xbf16>
    %c1_141 = arith.constant 1 : index
    %c56_142 = arith.constant 56 : index
    %c0_143 = arith.constant 0 : index
    %211 = vector.load %arg8[%c1_141, %c56_142, %c0_143] : memref<2x72x256xbf16, #tpu.memory_space<vmem>>, vector<1x8x256xbf16>
    %212 = vector.shape_cast %211 : vector<1x8x256xbf16> to vector<8x256xbf16>
    %213 = vector.shape_cast %210 : vector<8x256xbf16> to vector<1x8x256xbf16>
    tpu.vector_store %arg8[%c1_141, %c56_142, %c0_143], %213 {strides = array<i32>} : memref<2x72x256xbf16, #tpu.memory_space<vmem>>, vector<1x8x256xbf16>,
    %c0_144 = arith.constant 0 : index
    %c24_145 = arith.constant 24 : index
    %c0_146 = arith.constant 0 : index
    %214 = vector.load %arg2[%c0_144, %c24_145, %c0_146] : memref<1x96x256xbf16, #tpu.memory_space<vmem>>, vector<1x8x256xbf16>
    %215 = vector.shape_cast %214 : vector<1x8x256xbf16> to vector<8x256xbf16>
    %c1_147 = arith.constant 1 : index
    %c64_148 = arith.constant 64 : index
    %c0_149 = arith.constant 0 : index
    %216 = vector.load %arg8[%c1_147, %c64_148, %c0_149] : memref<2x72x256xbf16, #tpu.memory_space<vmem>>, vector<1x8x256xbf16>
    %217 = vector.shape_cast %216 : vector<1x8x256xbf16> to vector<8x256xbf16>
    %218 = vector.shape_cast %215 : vector<8x256xbf16> to vector<1x8x256xbf16>
    tpu.vector_store %arg8[%c1_147, %c64_148, %c0_149], %218 {strides = array<i32>} : memref<2x72x256xbf16, #tpu.memory_space<vmem>>, vector<1x8x256xbf16>,
    %c1_150 = arith.constant 1 : index
    %c0_151 = arith.constant 0 : index
    %c0_152 = arith.constant 0 : index
    %219 = vector.load %arg3[%c1_150, %c0_151, %c0_152] : memref<3x8x72xbf16, #tpu.memory_space<vmem>>, vector<1x8x72xbf16>
    %220 = vector.shape_cast %219 : vector<1x8x72xbf16> to vector<8x72xbf16>
    %c1_153 = arith.constant 1 : index
    %c0_154 = arith.constant 0 : index
    %c0_155 = arith.constant 0 : index
    %221 = vector.load %arg8[%c1_153, %c0_154, %c0_155] : memref<2x72x256xbf16, #tpu.memory_space<vmem>>, vector<1x72x256xbf16>
    %222 = vector.shape_cast %221 : vector<1x72x256xbf16> to vector<72x256xbf16>
    %cst_156 = arith.constant dense<0.000000e+00> : vector<8x256xf32>
    %223 = tpu.matmul %220, %222, %cst_156 {dimension_numbers = #tpu.dot_dimension_numbers<[1], [0], [0], [1], [0, 0, 1, 1], [], []>} : vector<8x72xbf16>, vector<72x256xbf16>, vector<8x256xf32> -> vector<8x256xf32>
    %224 = arith.addf %133, %223 : vector<8x256xf32>
    %c0_157 = arith.constant 0 : index
    %c56_158 = arith.constant 56 : index
    %c0_159 = arith.constant 0 : index
    %225 = vector.load %arg2[%c0_157, %c56_158, %c0_159] : memref<1x96x256xbf16, #tpu.memory_space<vmem>>, vector<1x8x256xbf16>
    %226 = vector.shape_cast %225 : vector<1x8x256xbf16> to vector<8x256xbf16>
    %227 = vector.extract_strided_slice %226 {offsets = [0, 0], sizes = [8, 247], strides = [1, 1]} : vector<8x256xbf16> to vector<8x247xbf16>
    %228 = vector.extract_strided_slice %43 {offsets = [0, 9], sizes = [1, 247], strides = [1, 1]} : vector<1x256xbf16> to vector<1x247xbf16>
    %229 = vector.broadcast %228 : vector<1x247xbf16> to vector<8x247xbf16>
    %230 = arith.mulf %227, %229 : vector<8x247xbf16>
    %cst_160 = arith.constant 0.000000e+00 : bf16
    %231 = vector.broadcast %cst_160 : bf16 to vector<8x9xbf16>
    %c0_161 = arith.constant 0 : index
    %c0_162 = arith.constant 0 : index
    %c0_163 = arith.constant 0 : index
    %232 = vector.load %arg8[%c0_161, %c0_162, %c0_163] : memref<2x72x256xbf16, #tpu.memory_space<vmem>>, vector<1x8x9xbf16>
    %233 = vector.shape_cast %232 : vector<1x8x9xbf16> to vector<8x9xbf16>
    %234 = vector.shape_cast %231 : vector<8x9xbf16> to vector<1x8x9xbf16>
    tpu.vector_store %arg8[%c0_161, %c0_162, %c0_163], %234 {strides = array<i32>} : memref<2x72x256xbf16, #tpu.memory_space<vmem>>, vector<1x8x9xbf16>,
    %c0_164 = arith.constant 0 : index
    %c0_165 = arith.constant 0 : index
    %c9_166 = arith.constant 9 : index
    %235 = vector.load %arg8[%c0_164, %c0_165, %c9_166] : memref<2x72x256xbf16, #tpu.memory_space<vmem>>, vector<1x8x247xbf16>
    %236 = vector.shape_cast %235 : vector<1x8x247xbf16> to vector<8x247xbf16>
    %237 = vector.shape_cast %230 : vector<8x247xbf16> to vector<1x8x247xbf16>
    tpu.vector_store %arg8[%c0_164, %c0_165, %c9_166], %237 {strides = array<i32>} : memref<2x72x256xbf16, #tpu.memory_space<vmem>>, vector<1x8x247xbf16>,
    %c0_167 = arith.constant 0 : index
    %c48_168 = arith.constant 48 : index
    %c0_169 = arith.constant 0 : index
    %238 = vector.load %arg2[%c0_167, %c48_168, %c0_169] : memref<1x96x256xbf16, #tpu.memory_space<vmem>>, vector<1x8x256xbf16>
    %239 = vector.shape_cast %238 : vector<1x8x256xbf16> to vector<8x256xbf16>
    %240 = vector.extract_strided_slice %239 {offsets = [0, 0], sizes = [8, 248], strides = [1, 1]} : vector<8x256xbf16> to vector<8x248xbf16>
    %241 = vector.extract_strided_slice %21 {offsets = [0, 8], sizes = [1, 248], strides = [1, 1]} : vector<1x256xbf16> to vector<1x248xbf16>
    %242 = vector.broadcast %241 : vector<1x248xbf16> to vector<8x248xbf16>
    %243 = arith.mulf %240, %242 : vector<8x248xbf16>
    %cst_170 = arith.constant 0.000000e+00 : bf16
    %244 = vector.broadcast %cst_170 : bf16 to vector<8x8xbf16>
    %c0_171 = arith.constant 0 : index
    %c8_172 = arith.constant 8 : index
    %c0_173 = arith.constant 0 : index
    %245 = vector.load %arg8[%c0_171, %c8_172, %c0_173] : memref<2x72x256xbf16, #tpu.memory_space<vmem>>, vector<1x8x8xbf16>
    %246 = vector.shape_cast %245 : vector<1x8x8xbf16> to vector<8x8xbf16>
    %247 = vector.shape_cast %244 : vector<8x8xbf16> to vector<1x8x8xbf16>
    tpu.vector_store %arg8[%c0_171, %c8_172, %c0_173], %247 {strides = array<i32>} : memref<2x72x256xbf16, #tpu.memory_space<vmem>>, vector<1x8x8xbf16>,
    %c0_174 = arith.constant 0 : index
    %c8_175 = arith.constant 8 : index
    %c8_176 = arith.constant 8 : index
    %248 = vector.load %arg8[%c0_174, %c8_175, %c8_176] : memref<2x72x256xbf16, #tpu.memory_space<vmem>>, vector<1x8x248xbf16>
    %249 = vector.shape_cast %248 : vector<1x8x248xbf16> to vector<8x248xbf16>
    %250 = vector.shape_cast %243 : vector<8x248xbf16> to vector<1x8x248xbf16>
    tpu.vector_store %arg8[%c0_174, %c8_175, %c8_176], %250 {strides = array<i32>} : memref<2x72x256xbf16, #tpu.memory_space<vmem>>, vector<1x8x248xbf16>,
    %c0_177 = arith.constant 0 : index
    %c56_178 = arith.constant 56 : index
    %c0_179 = arith.constant 0 : index
    %251 = vector.load %arg2[%c0_177, %c56_178, %c0_179] : memref<1x96x256xbf16, #tpu.memory_space<vmem>>, vector<1x8x256xbf16>
    %252 = vector.shape_cast %251 : vector<1x8x256xbf16> to vector<8x256xbf16>
    %253 = vector.extract_strided_slice %252 {offsets = [0, 0], sizes = [8, 248], strides = [1, 1]} : vector<8x256xbf16> to vector<8x248xbf16>
    %254 = vector.extract_strided_slice %21 {offsets = [0, 8], sizes = [1, 248], strides = [1, 1]} : vector<1x256xbf16> to vector<1x248xbf16>
    %255 = vector.broadcast %254 : vector<1x248xbf16> to vector<8x248xbf16>
    %256 = arith.mulf %253, %255 : vector<8x248xbf16>
    %cst_180 = arith.constant 0.000000e+00 : bf16
    %257 = vector.broadcast %cst_180 : bf16 to vector<8x8xbf16>
    %c0_181 = arith.constant 0 : index
    %c16_182 = arith.constant 16 : index
    %c0_183 = arith.constant 0 : index
    %258 = vector.load %arg8[%c0_181, %c16_182, %c0_183] : memref<2x72x256xbf16, #tpu.memory_space<vmem>>, vector<1x8x8xbf16>
    %259 = vector.shape_cast %258 : vector<1x8x8xbf16> to vector<8x8xbf16>
    %260 = vector.shape_cast %257 : vector<8x8xbf16> to vector<1x8x8xbf16>
    tpu.vector_store %arg8[%c0_181, %c16_182, %c0_183], %260 {strides = array<i32>} : memref<2x72x256xbf16, #tpu.memory_space<vmem>>, vector<1x8x8xbf16>,
    %c0_184 = arith.constant 0 : index
    %c16_185 = arith.constant 16 : index
    %c8_186 = arith.constant 8 : index
    %261 = vector.load %arg8[%c0_184, %c16_185, %c8_186] : memref<2x72x256xbf16, #tpu.memory_space<vmem>>, vector<1x8x248xbf16>
    %262 = vector.shape_cast %261 : vector<1x8x248xbf16> to vector<8x248xbf16>
    %263 = vector.shape_cast %256 : vector<8x248xbf16> to vector<1x8x248xbf16>
    tpu.vector_store %arg8[%c0_184, %c16_185, %c8_186], %263 {strides = array<i32>} : memref<2x72x256xbf16, #tpu.memory_space<vmem>>, vector<1x8x248xbf16>,
    %c0_187 = arith.constant 0 : index
    %c40_188 = arith.constant 40 : index
    %c0_189 = arith.constant 0 : index
    %264 = vector.load %arg2[%c0_187, %c40_188, %c0_189] : memref<1x96x256xbf16, #tpu.memory_space<vmem>>, vector<1x8x256xbf16>
    %265 = vector.shape_cast %264 : vector<1x8x256xbf16> to vector<8x256xbf16>
    %266 = vector.extract_strided_slice %265 {offsets = [0, 0], sizes = [8, 255], strides = [1, 1]} : vector<8x256xbf16> to vector<8x255xbf16>
    %267 = vector.extract_strided_slice %42 {offsets = [0, 1], sizes = [1, 255], strides = [1, 1]} : vector<1x256xbf16> to vector<1x255xbf16>
    %268 = vector.broadcast %267 : vector<1x255xbf16> to vector<8x255xbf16>
    %269 = arith.mulf %266, %268 : vector<8x255xbf16>
    %cst_190 = arith.constant 0.000000e+00 : bf16
    %270 = vector.broadcast %cst_190 : bf16 to vector<8x1xbf16>
    %c0_191 = arith.constant 0 : index
    %c24_192 = arith.constant 24 : index
    %c0_193 = arith.constant 0 : index
    %271 = vector.load %arg8[%c0_191, %c24_192, %c0_193] : memref<2x72x256xbf16, #tpu.memory_space<vmem>>, vector<1x8x1xbf16>
    %272 = vector.shape_cast %271 : vector<1x8x1xbf16> to vector<8x1xbf16>
    %273 = vector.shape_cast %270 : vector<8x1xbf16> to vector<1x8x1xbf16>
    tpu.vector_store %arg8[%c0_191, %c24_192, %c0_193], %273 {strides = array<i32>} : memref<2x72x256xbf16, #tpu.memory_space<vmem>>, vector<1x8x1xbf16>,
    %c0_194 = arith.constant 0 : index
    %c24_195 = arith.constant 24 : index
    %c1_196 = arith.constant 1 : index
    %274 = vector.load %arg8[%c0_194, %c24_195, %c1_196] : memref<2x72x256xbf16, #tpu.memory_space<vmem>>, vector<1x8x255xbf16>
    %275 = vector.shape_cast %274 : vector<1x8x255xbf16> to vector<8x255xbf16>
    %276 = vector.shape_cast %269 : vector<8x255xbf16> to vector<1x8x255xbf16>
    tpu.vector_store %arg8[%c0_194, %c24_195, %c1_196], %276 {strides = array<i32>} : memref<2x72x256xbf16, #tpu.memory_space<vmem>>, vector<1x8x255xbf16>,
    %c0_197 = arith.constant 0 : index
    %c32_198 = arith.constant 32 : index
    %c0_199 = arith.constant 0 : index
    %277 = vector.load %arg2[%c0_197, %c32_198, %c0_199] : memref<1x96x256xbf16, #tpu.memory_space<vmem>>, vector<1x8x256xbf16>
    %278 = vector.shape_cast %277 : vector<1x8x256xbf16> to vector<8x256xbf16>
    %c0_200 = arith.constant 0 : index
    %c32_201 = arith.constant 32 : index
    %c0_202 = arith.constant 0 : index
    %279 = vector.load %arg8[%c0_200, %c32_201, %c0_202] : memref<2x72x256xbf16, #tpu.memory_space<vmem>>, vector<1x8x256xbf16>
    %280 = vector.shape_cast %279 : vector<1x8x256xbf16> to vector<8x256xbf16>
    %281 = vector.shape_cast %278 : vector<8x256xbf16> to vector<1x8x256xbf16>
    tpu.vector_store %arg8[%c0_200, %c32_201, %c0_202], %281 {strides = array<i32>} : memref<2x72x256xbf16, #tpu.memory_space<vmem>>, vector<1x8x256xbf16>,
    %c0_203 = arith.constant 0 : index
    %c40_204 = arith.constant 40 : index
    %c0_205 = arith.constant 0 : index
    %282 = vector.load %arg2[%c0_203, %c40_204, %c0_205] : memref<1x96x256xbf16, #tpu.memory_space<vmem>>, vector<1x8x256xbf16>
    %283 = vector.shape_cast %282 : vector<1x8x256xbf16> to vector<8x256xbf16>
    %c0_206 = arith.constant 0 : index
    %c40_207 = arith.constant 40 : index
    %c0_208 = arith.constant 0 : index
    %284 = vector.load %arg8[%c0_206, %c40_207, %c0_208] : memref<2x72x256xbf16, #tpu.memory_space<vmem>>, vector<1x8x256xbf16>
    %285 = vector.shape_cast %284 : vector<1x8x256xbf16> to vector<8x256xbf16>
    %286 = vector.shape_cast %283 : vector<8x256xbf16> to vector<1x8x256xbf16>
    tpu.vector_store %arg8[%c0_206, %c40_207, %c0_208], %286 {strides = array<i32>} : memref<2x72x256xbf16, #tpu.memory_space<vmem>>, vector<1x8x256xbf16>,
    %c0_209 = arith.constant 0 : index
    %c56_210 = arith.constant 56 : index
    %c0_211 = arith.constant 0 : index
    %287 = vector.load %arg2[%c0_209, %c56_210, %c0_211] : memref<1x96x256xbf16, #tpu.memory_space<vmem>>, vector<1x8x256xbf16>
    %288 = vector.shape_cast %287 : vector<1x8x256xbf16> to vector<8x256xbf16>
    %289 = vector.extract_strided_slice %288 {offsets = [0, 0], sizes = [8, 255], strides = [1, 1]} : vector<8x256xbf16> to vector<8x255xbf16>
    %290 = vector.extract_strided_slice %42 {offsets = [0, 1], sizes = [1, 255], strides = [1, 1]} : vector<1x256xbf16> to vector<1x255xbf16>
    %291 = vector.broadcast %290 : vector<1x255xbf16> to vector<8x255xbf16>
    %292 = arith.mulf %289, %291 : vector<8x255xbf16>
    %cst_212 = arith.constant 0.000000e+00 : bf16
    %293 = vector.broadcast %cst_212 : bf16 to vector<8x1xbf16>
    %c0_213 = arith.constant 0 : index
    %c48_214 = arith.constant 48 : index
    %c0_215 = arith.constant 0 : index
    %294 = vector.load %arg8[%c0_213, %c48_214, %c0_215] : memref<2x72x256xbf16, #tpu.memory_space<vmem>>, vector<1x8x1xbf16>
    %295 = vector.shape_cast %294 : vector<1x8x1xbf16> to vector<8x1xbf16>
    %296 = vector.shape_cast %293 : vector<8x1xbf16> to vector<1x8x1xbf16>
    tpu.vector_store %arg8[%c0_213, %c48_214, %c0_215], %296 {strides = array<i32>} : memref<2x72x256xbf16, #tpu.memory_space<vmem>>, vector<1x8x1xbf16>,
    %c0_216 = arith.constant 0 : index
    %c48_217 = arith.constant 48 : index
    %c1_218 = arith.constant 1 : index
    %297 = vector.load %arg8[%c0_216, %c48_217, %c1_218] : memref<2x72x256xbf16, #tpu.memory_space<vmem>>, vector<1x8x255xbf16>
    %298 = vector.shape_cast %297 : vector<1x8x255xbf16> to vector<8x255xbf16>
    %299 = vector.shape_cast %292 : vector<8x255xbf16> to vector<1x8x255xbf16>
    tpu.vector_store %arg8[%c0_216, %c48_217, %c1_218], %299 {strides = array<i32>} : memref<2x72x256xbf16, #tpu.memory_space<vmem>>, vector<1x8x255xbf16>,
    %c0_219 = arith.constant 0 : index
    %c48_220 = arith.constant 48 : index
    %c0_221 = arith.constant 0 : index
    %300 = vector.load %arg2[%c0_219, %c48_220, %c0_221] : memref<1x96x256xbf16, #tpu.memory_space<vmem>>, vector<1x8x256xbf16>
    %301 = vector.shape_cast %300 : vector<1x8x256xbf16> to vector<8x256xbf16>
    %c0_222 = arith.constant 0 : index
    %c56_223 = arith.constant 56 : index
    %c0_224 = arith.constant 0 : index
    %302 = vector.load %arg8[%c0_222, %c56_223, %c0_224] : memref<2x72x256xbf16, #tpu.memory_space<vmem>>, vector<1x8x256xbf16>
    %303 = vector.shape_cast %302 : vector<1x8x256xbf16> to vector<8x256xbf16>
    %304 = vector.shape_cast %301 : vector<8x256xbf16> to vector<1x8x256xbf16>
    tpu.vector_store %arg8[%c0_222, %c56_223, %c0_224], %304 {strides = array<i32>} : memref<2x72x256xbf16, #tpu.memory_space<vmem>>, vector<1x8x256xbf16>,
    %c0_225 = arith.constant 0 : index
    %c56_226 = arith.constant 56 : index
    %c0_227 = arith.constant 0 : index
    %305 = vector.load %arg2[%c0_225, %c56_226, %c0_227] : memref<1x96x256xbf16, #tpu.memory_space<vmem>>, vector<1x8x256xbf16>
    %306 = vector.shape_cast %305 : vector<1x8x256xbf16> to vector<8x256xbf16>
    %c0_228 = arith.constant 0 : index
    %c64_229 = arith.constant 64 : index
    %c0_230 = arith.constant 0 : index
    %307 = vector.load %arg8[%c0_228, %c64_229, %c0_230] : memref<2x72x256xbf16, #tpu.memory_space<vmem>>, vector<1x8x256xbf16>
    %308 = vector.shape_cast %307 : vector<1x8x256xbf16> to vector<8x256xbf16>
    %309 = vector.shape_cast %306 : vector<8x256xbf16> to vector<1x8x256xbf16>
    tpu.vector_store %arg8[%c0_228, %c64_229, %c0_230], %309 {strides = array<i32>} : memref<2x72x256xbf16, #tpu.memory_space<vmem>>, vector<1x8x256xbf16>,
    %c2 = arith.constant 2 : index
    %c0_231 = arith.constant 0 : index
    %c0_232 = arith.constant 0 : index
    %310 = vector.load %arg3[%c2, %c0_231, %c0_232] : memref<3x8x72xbf16, #tpu.memory_space<vmem>>, vector<1x8x72xbf16>
    %311 = vector.shape_cast %310 : vector<1x8x72xbf16> to vector<8x72xbf16>
    %c0_233 = arith.constant 0 : index
    %c0_234 = arith.constant 0 : index
    %c0_235 = arith.constant 0 : index
    %312 = vector.load %arg8[%c0_233, %c0_234, %c0_235] : memref<2x72x256xbf16, #tpu.memory_space<vmem>>, vector<1x72x256xbf16>
    %313 = vector.shape_cast %312 : vector<1x72x256xbf16> to vector<72x256xbf16>
    %cst_236 = arith.constant dense<0.000000e+00> : vector<8x256xf32>
    %314 = tpu.matmul %311, %313, %cst_236 {dimension_numbers = #tpu.dot_dimension_numbers<[1], [0], [0], [1], [0, 0, 1, 1], [], []>} : vector<8x72xbf16>, vector<72x256xbf16>, vector<8x256xf32> -> vector<8x256xf32>
    %315 = arith.addf %224, %314 : vector<8x256xf32>
    %c0_237 = arith.constant 0 : index
    %c0_238 = arith.constant 0 : index
    %316 = vector.load %arg4[%c0_237, %c0_238] : memref<8x1xf32, #tpu.memory_space<vmem>>, vector<8x1xf32>
    %317 = vector.broadcast %316 : vector<8x1xf32> to vector<8x256xf32>
    %318 = arith.addf %315, %317 : vector<8x256xf32>
    %c0_239 = arith.constant 0 : index
    %c0_240 = arith.constant 0 : index
    %c0_241 = arith.constant 0 : index
    %319 = vector.load %arg5[%c0_239, %c0_240, %c0_241] : memref<1x8x256xf32, #tpu.memory_space<vmem>>, vector<1x8x256xf32>
    %320 = vector.shape_cast %319 : vector<1x8x256xf32> to vector<8x256xf32>
    %321 = vector.shape_cast %318 : vector<8x256xf32> to vector<1x8x256xf32>
    tpu.vector_store %arg5[%c0_239, %c0_240, %c0_241], %321 {strides = array<i32>} : memref<1x8x256xf32, #tpu.memory_space<vmem>>, vector<1x8x256xf32>,
    %cst_242 = arith.constant dense<0.000000e+00> : vector<8xf32>
    %322 = vector.multi_reduction <add>, %318, %cst_242 [1] : vector<8x256xf32> to vector<8xf32>
    %323 = vector.shape_cast %322 : vector<8xf32> to vector<8x1xf32>
    %c0_243 = arith.constant 0 : index
    %c0_244 = arith.constant 0 : index
    %c0_245 = arith.constant 0 : index
    %c0_246 = arith.constant 0 : index
    %324 = vector.load %arg6[%c0_243, %c0_244, %c0_245, %c0_246] : memref<1x1x8x1xf32, #tpu.memory_space<vmem>>, vector<1x1x8x1xf32>
    %325 = vector.shape_cast %324 : vector<1x1x8x1xf32> to vector<8x1xf32>
    %326 = vector.shape_cast %323 : vector<8x1xf32> to vector<1x1x8x1xf32>
    tpu.vector_store %arg6[%c0_243, %c0_244, %c0_245, %c0_246], %326 {strides = array<i32>} : memref<1x1x8x1xf32, #tpu.memory_space<vmem>>, vector<1x1x8x1xf32>,
    %327 = arith.mulf %318, %318 : vector<8x256xf32>
    %cst_247 = arith.constant dense<0.000000e+00> : vector<8xf32>
    %328 = vector.multi_reduction <add>, %327, %cst_247 [1] : vector<8x256xf32> to vector<8xf32>
    %329 = vector.shape_cast %328 : vector<8xf32> to vector<8x1xf32>
    %c0_248 = arith.constant 0 : index
    %c0_249 = arith.constant 0 : index
    %c0_250 = arith.constant 0 : index
    %c0_251 = arith.constant 0 : index
    %330 = vector.load %arg7[%c0_248, %c0_249, %c0_250, %c0_251] : memref<1x1x8x1xf32, #tpu.memory_space<vmem>>, vector<1x1x8x1xf32>
    %331 = vector.shape_cast %330 : vector<1x1x8x1xf32> to vector<8x1xf32>
    %332 = vector.shape_cast %329 : vector<8x1xf32> to vector<1x1x8x1xf32>
    tpu.vector_store %arg7[%c0_248, %c0_249, %c0_250, %c0_251], %332 {strides = array<i32>} : memref<1x1x8x1xf32, #tpu.memory_space<vmem>>, vector<1x1x8x1xf32>,
    return
  }
  func.func @transform_0(%arg0: i32, %arg1: i32) -> (i32, i32, i32) {
    %c0_i32 = arith.constant 0 : i32
    %c0_i32_0 = arith.constant 0 : i32
    return %arg0, %c0_i32, %arg1 : i32, i32, i32
  }
  func.func @transform_1(%arg0: i32, %arg1: i32) -> (i32, i32, i32) {
    %c0_i32 = arith.constant 0 : i32
    %c0_i32_0 = arith.constant 0 : i32
    %c0_i32_1 = arith.constant 0 : i32
    %c0_i32_2 = arith.constant 0 : i32
    return %c0_i32, %c0_i32_0, %c0_i32_1 : i32, i32, i32
  }
  func.func @transform_2(%arg0: i32, %arg1: i32) -> (i32, i32) {
    %c0_i32 = arith.constant 0 : i32
    %c0_i32_0 = arith.constant 0 : i32
    %c0_i32_1 = arith.constant 0 : i32
    return %c0_i32, %c0_i32_0 : i32, i32
  }
  func.func @transform_3(%arg0: i32, %arg1: i32) -> (i32, i32, i32) {
    %c0_i32 = arith.constant 0 : i32
    %c0_i32_0 = arith.constant 0 : i32
    return %arg0, %c0_i32, %arg1 : i32, i32, i32
  }
  func.func @transform_4(%arg0: i32, %arg1: i32) -> (i32, i32, i32, i32) {
    %c0_i32 = arith.constant 0 : i32
    %c0_i32_0 = arith.constant 0 : i32
    %c0_i32_1 = arith.constant 0 : i32
    return %arg0, %arg1, %c0_i32, %c0_i32_0 : i32, i32, i32, i32
  }
  func.func @transform_5(%arg0: i32, %arg1: i32) -> (i32, i32, i32, i32) {
    %c0_i32 = arith.constant 0 : i32
    %c0_i32_0 = arith.constant 0 : i32
    %c0_i32_1 = arith.constant 0 : i32
    return %arg0, %arg1, %c0_i32, %c0_i32_0 : i32, i32, i32, i32
  }
}

module attributes {stable_mosaic.version = 11 : i64} {
  func.func @_norm_act_kernel(%arg0: i32, %arg1: i32, %arg2: memref<1x8x256xf32, #tpu.memory_space<vmem>>, %arg3: memref<1x8x1xf32, #tpu.memory_space<vmem>>, %arg4: memref<1x8x1xf32, #tpu.memory_space<vmem>>, %arg5: memref<1x8x256xf32, #tpu.memory_space<vmem>>) attributes {dimension_semantics = [#tpu.dimension_semantics<parallel>, #tpu.dimension_semantics<parallel>], iteration_bounds = array<i64: 2, 2>, scalar_prefetch = 0 : i64, scratch_operands = 0 : i64, tpu.core_type = #tpu.core_type<tc>, window_params = [{transform_indices = @transform_0, window_bounds = array<i64: 1, 8, 256>}, {transform_indices = @transform_1, window_bounds = array<i64: 1, 8, 1>}, {transform_indices = @transform_2, window_bounds = array<i64: 1, 8, 1>}, {transform_indices = @transform_3, window_bounds = array<i64: 1, 8, 256>}]} {
    %c0 = arith.constant 0 : index
    %c0_0 = arith.constant 0 : index
    %c0_1 = arith.constant 0 : index
    %0 = vector.load %arg2[%c0, %c0_0, %c0_1] : memref<1x8x256xf32, #tpu.memory_space<vmem>>, vector<1x8x256xf32>
    %1 = vector.shape_cast %0 : vector<1x8x256xf32> to vector<8x256xf32>
    %c0_2 = arith.constant 0 : index
    %c0_3 = arith.constant 0 : index
    %c0_4 = arith.constant 0 : index
    %2 = vector.load %arg3[%c0_2, %c0_3, %c0_4] : memref<1x8x1xf32, #tpu.memory_space<vmem>>, vector<1x8x1xf32>
    %3 = vector.shape_cast %2 : vector<1x8x1xf32> to vector<8x1xf32>
    %4 = vector.broadcast %3 : vector<8x1xf32> to vector<8x256xf32>
    %5 = arith.subf %1, %4 : vector<8x256xf32>
    %c0_5 = arith.constant 0 : index
    %c0_6 = arith.constant 0 : index
    %c0_7 = arith.constant 0 : index
    %6 = vector.load %arg4[%c0_5, %c0_6, %c0_7] : memref<1x8x1xf32, #tpu.memory_space<vmem>>, vector<1x8x1xf32>
    %7 = vector.shape_cast %6 : vector<1x8x1xf32> to vector<8x1xf32>
    %8 = vector.broadcast %7 : vector<8x1xf32> to vector<8x256xf32>
    %9 = arith.mulf %5, %8 : vector<8x256xf32>
    %cst = arith.constant 0.000000e+00 : f32
    %10 = vector.broadcast %cst : f32 to vector<8x256xf32>
    %11 = arith.cmpf oge, %9, %10 : vector<8x256xf32>
    %cst_8 = arith.constant 2.000000e-01 : f32
    %12 = vector.broadcast %cst_8 : f32 to vector<8x256xf32>
    %13 = arith.mulf %12, %9 : vector<8x256xf32>
    %14 = arith.select %11, %9, %13 : vector<8x256xi1>, vector<8x256xf32>
    %c0_9 = arith.constant 0 : index
    %c0_10 = arith.constant 0 : index
    %c0_11 = arith.constant 0 : index
    %15 = vector.load %arg5[%c0_9, %c0_10, %c0_11] : memref<1x8x256xf32, #tpu.memory_space<vmem>>, vector<1x8x256xf32>
    %16 = vector.shape_cast %15 : vector<1x8x256xf32> to vector<8x256xf32>
    %17 = vector.shape_cast %14 : vector<8x256xf32> to vector<1x8x256xf32>
    tpu.vector_store %arg5[%c0_9, %c0_10, %c0_11], %17 {strides = array<i32>} : memref<1x8x256xf32, #tpu.memory_space<vmem>>, vector<1x8x256xf32>,
    return
  }
  func.func @transform_0(%arg0: i32, %arg1: i32) -> (i32, i32, i32) {
    %c0_i32 = arith.constant 0 : i32
    %c0_i32_0 = arith.constant 0 : i32
    return %arg0, %c0_i32, %arg1 : i32, i32, i32
  }
  func.func @transform_1(%arg0: i32, %arg1: i32) -> (i32, i32, i32) {
    %c0_i32 = arith.constant 0 : i32
    %c0_i32_0 = arith.constant 0 : i32
    %c0_i32_1 = arith.constant 0 : i32
    return %arg0, %c0_i32, %c0_i32_0 : i32, i32, i32
  }
  func.func @transform_2(%arg0: i32, %arg1: i32) -> (i32, i32, i32) {
    %c0_i32 = arith.constant 0 : i32
    %c0_i32_0 = arith.constant 0 : i32
    %c0_i32_1 = arith.constant 0 : i32
    return %arg0, %c0_i32, %c0_i32_0 : i32, i32, i32
  }
  func.func @transform_3(%arg0: i32, %arg1: i32) -> (i32, i32, i32) {
    %c0_i32 = arith.constant 0 : i32
    %c0_i32_0 = arith.constant 0 : i32
    return %arg0, %c0_i32, %arg1 : i32, i32, i32
  }
}

</mosaic_0001>

<bundles_post_ra>
// kernel: unet_down_forward.2
= control target key start
LH: loop header
LB: loop body
LE: loop exit
PB: predicated region body
PF: predicated region fallthrough
CT: control target
= control target key end

     0   :  { %s1432_s18 = smov 0   ;;  %s1434_s19 = smov 0   ;;  %s1733_s0 = inlined_call_operand.vmem [shape: bf16[2,96,512], index: 0, kind: input, shape index: {}]   ;;  %s1734_s1 = inlined_call_operand.vmem [shape: bf16[3,8,72], index: 1, kind: input, shape index: {}]   ;;  %s1735_s2 = inlined_call_operand.vmem [shape: f32[8,1], index: 2, kind: input, shape index: {}]   ;;  %s1736_s3 = inlined_call_operand.vmem [shape: f32[2,8,512], index: 3, kind: output, shape index: {0}]   ;;  %s1737_s4 = inlined_call_operand.vmem [shape: f32[2,2,8,1], index: 4, kind: output, shape index: {1}]   ;;  %s1738_s5 = inlined_call_operand.vmem [shape: f32[2,2,8,1], index: 5, kind: output, shape index: {2}]  }
   0x1   :  { %s1436_s20 = smov 0   ;;  %s1438_s21 = smov 0  }
   0x2   :  { %s1440_s22 = smov 0   ;;  %s1442_s23 = smov 0  }
   0x3   :  { %s1444_s24 = smov 0  }
   0x4 LB: > { %s25_s25 = sadd.s32 1, %s1384_s22  ;;  %s28_s26 = sadd.s32 1, %s1388_s23  ;;  %s1392_s24 = sphi %s1444_s24, %s16_s24   ;;  %s1388_s23 = sphi %s1442_s23, %s1750_s23   ;;  %s1384_s22 = sphi %s1440_s22, %s1749_s22   ;;  %s1380_s21 = sphi %s1438_s21, %s1748_s21   ;;  %s1376_s20 = sphi %s1436_s20, %s1747_s20   ;;  %s1372_s19 = sphi %s1434_s19, %s1746_s19   ;;  %s1368_s18 = sphi %s1432_s18, %s1745_s18  }
   0x5   : > { %p26_p0 = scmp.ge.s32.totalorder %s25_s25, 2  ;;  %p44_p1 = scmp.ne.s32.totalorder %s1372_s19, %s1368_s18 }
   0x6   : > { %p45_p2 = scmp.eq.s32.totalorder %s1392_s24, 0  ;;  %s37_s30 = sadd.s32 1, %s1372_s19 }
   0x7   : > { %s1752_s25 = smov (%p26_p0, %s25_s25), 0  ;;  %s1754_s26 = smov (!%p26_p0, %s28_s26), %s1388_s23 }
   0x8   : > { %p46_p3 = por %p45_p2, %p44_p1  ;;  %p30_p4 = scmp.ge.s32.totalorder %s1754_s26, 2 }
   0x9   : > { %s33_s27 = ssub.s32 %s1384_s22, %s1752_s25  ;;  %p1196_p6 = scmp.ge.s32.totalorder %s1392_s24, 4 }
   0xa   : > { %s1756_s26 = smov (%p30_p4, %s1754_s26), 0 }
   0xb   : > { %s32_s28 = ssub.s32 %s1388_s23, %s1756_s26  ;;  %202 = sbr.rel (%p1196_p6) target bundleno = 32 (0x20), region = 24 }
   0xc   : > { %s34_s29 = sor.u32 %s33_s27, %s32_s28 }
   0xd   : > { %p35_p5 = scmp.eq.s32.totalorder %s34_s29, 0 }
   0xf   : > { %s1483_s6 = scalar_select %p35_p5, %s1372_s19, %s37_s30  }
  0x12   : > { %205 = sbr.rel (!%p46_p3) target bundleno = 32 (0x20), region = 28  ;;  %s207_s7 = sand.u32 (%p46_p3), 1, %s1372_s19  }
  0x13   : > { %s1256_s8 = smul.u32 (%p46_p3), 96, %s207_s7  ;;  %s1197_s9 = sshll.u32 (%p46_p3), %s1384_s22, 1 }
  0x14   : > { %s1257_s10 = smul.u32 (%p46_p3), 48, %s1388_s23 }
  0x15   : > { %s209_s16 = scalar_lea.vmem (%p46_p3), [#allocation3], %s1256_s8 }
  0x16   : > { %s212_s11 = sadd.s32 (%p46_p3), %s1257_s10, %s1197_s9 }
  0x17   : > { %s1198_s12 = sshll.u32 (%p46_p3), %s212_s11, 2 }
  0x18   : > { %s214_s15 = scalar_lea.vmem (%p46_p3), %s1733_s0, %s1198_s12 }
  0x19   : > { %v264_v0 = vld [vmem:[%s214_s15] sm:$0xff]  ;;  %v266_v1 = vld [vmem:[%s214_s15 + $0x10] sm:$0xff] }
  0x1a   : > { %v268_v2 = vld [vmem:[%s214_s15 + $0x20] sm:$0xff]  ;;  %265 = vst [vmem:[%s209_s16] sm:$0xff] %v264_v0  ;;  %267 = vst [vmem:[%s209_s16 + $0x8] sm:$0xff] %v266_v1  ;;  %v270_v3 = vld [vmem:[%s214_s15 + $0x30] sm:$0xff] }
  0x1b   : > { %269 = vst [vmem:[%s209_s16 + $0x10] sm:$0xff] %v268_v2  ;;  %v272_v4 = vld [vmem:[%s214_s15 + $0x40] sm:$0xff]  ;;  %v274_v5 = vld [vmem:[%s214_s15 + $0x50] sm:$0xff]  ;;  %271 = vst [vmem:[%s209_s16 + $0x18] sm:$0xff] %v270_v3 }
  0x1c   : > { %273 = vst [vmem:[%s209_s16 + $0x20] sm:$0xff] %v272_v4  ;;  %275 = vst [vmem:[%s209_s16 + $0x28] sm:$0xff] %v274_v5  ;;  %v276_v6 = vld [vmem:[%s214_s15 + $0x60] sm:$0xff]  ;;  %v278_v7 = vld [vmem:[%s214_s15 + $0x70] sm:$0xff] }
  0x1d   : > { %v280_v8 = vld [vmem:[%s214_s15 + $0x80] sm:$0xff]  ;;  %277 = vst [vmem:[%s209_s16 + $0x30] sm:$0xff] %v276_v6  ;;  %279 = vst [vmem:[%s209_s16 + $0x38] sm:$0xff] %v278_v7  ;;  %v282_v9 = vld [vmem:[%s214_s15 + $0x90] sm:$0xff] }
  0x1e   : > { %281 = vst [vmem:[%s209_s16 + $0x40] sm:$0xff] %v280_v8  ;;  %v284_v10 = vld [vmem:[%s214_s15 + $0xa0] sm:$0xff]  ;;  %v286_v11 = vld [vmem:[%s214_s15 + $0xb0] sm:$0xff]  ;;  %283 = vst [vmem:[%s209_s16 + $0x48] sm:$0xff] %v282_v9 }
  0x1f   : > { %285 = vst [vmem:[%s209_s16 + $0x50] sm:$0xff] %v284_v10  ;;  %287 = vst [vmem:[%s209_s16 + $0x58] sm:$0xff] %v286_v11 }
  0x20 PF: > { %p1199_p7 = scmp.ge.s32.totalorder %s1392_s24, 1  ;;  %p292_p8 = scmp.lt.s32.totalorder %s1392_s24, 5 }
  0x22   : > { %p293_p9 = pnand %p1199_p7, %p292_p8 }
  0x23   : > { %v374_v12 = vlaneseq (!%p293_p9)  ;;  %s299_s17 = sand.u32 (!%p293_p9), 1, %s1368_s18   ;;  %v1394_v21 = vmov (!%p293_p9), 0.0   ;;  %s1395_s18 = smov (!%p293_p9), 127   ;;  %vm456_vm4 = vcmask (!%p293_p9), 68608   ;;  %v1398_v39 = vmov (!%p293_p9), 0   ;;  %v985_v5 = vld [vmem:[%s1735_s2] sm:$0xff] (!%p293_p9) }
  0x24   : > { %296 = sbr.rel (%p293_p9) target bundleno = 707 (0x2c3), region = 66  ;;  %s1396_s29 = smov (!%p293_p9), 119   ;;  %560 = vst.msk [vmem:[#allocation2 + $0x48] sm:$0xf] (!%p293_p9), %vm456_vm4, %v1398_v39  ;;  %457 = vst.msk [vmem:[#allocation2] sm:$0xf] (!%p293_p9), %vm456_vm4, %v1398_v39  ;;  %715 = vmatprep.mubr.bf16.mxu0 (!%p293_p9), %v1398_v39  ;;  %810 = vmatprep.mubr.bf16.mxu1 (!%p293_p9), %v1398_v39 }
  0x25   : > { %v375_v13 = vand.u32 (!%p293_p9), 127, %v374_v12  ;;  %s1258_s27 = smul.u32 (!%p293_p9), 96, %s299_s17  ;;  %s1397_s30 = smov (!%p293_p9), 120   ;;  %1323 = vset.pattern.permute.xlu0 (!%p293_p9), %v1398_v39  ;;  %vm482_vm5 = vcmask (!%p293_p9), 60416   ;;  %vm452_vm6 = vcmask (!%p293_p9), 973824   ;;  %vm517_vm7 = vcmask (!%p293_p9), 3072  }
  0x26   : > { %570 = vst.msk [vmem:[#allocation2 + $0x50] sm:$0xf] (!%p293_p9), %vm482_vm5, %v1398_v39  ;;  %483 = vst.msk [vmem:[#allocation2 + $0x8] sm:$0xf] (!%p293_p9), %vm482_vm5, %v1398_v39  ;;  %vm478_vm8 = vcmask (!%p293_p9), 982016   ;;  %vm513_vm9 = vcmask (!%p293_p9), 1039360  }
  0x27   : > { %v376_v14 = vadd.s32 (!%p293_p9), 128, %v375_v13  ;;  %v381_v15 = vand.u32 (!%p293_p9), 63, %v375_v13  ;;  %v413_v16 = vand.u32 (!%p293_p9), 7, %v375_v13  ;;  %s1495_s28 = scalar_lea.vmem (!%p293_p9), [#allocation3], %s1258_s27  ;;  %496 = vst.msk [vmem:[#allocation2 + $0x10] sm:$0xf] (!%p293_p9), %vm482_vm5, %v1398_v39 }
  0x28   : > { %v1498_v17 = vld [vmem:[%s1495_s28 + $0x18] sm:$0xff] (!%p293_p9)  ;;  %v1504_v28 = vld [vmem:[%s1495_s28 + $0x10] sm:$0xff] (!%p293_p9)  ;;  %v1510_v34 = vld [vmem:[%s1495_s28 + $0x8] sm:$0xff] (!%p293_p9)  ;;  %580 = vst.msk [vmem:[#allocation2 + $0x58] sm:$0xf] (!%p293_p9), %vm482_vm5, %v1398_v39  ;;  %s1399_s7 = smov (!%p293_p9), 9  }
  0x29   : > { %v388_v18 = vand.u32 (!%p293_p9), 63, %v376_v14  ;;  %vm401_vm0 = vcmp.ge.s32.totalorder (!%p293_p9), %v381_v15, 8  ;;  %v420_v19 = vand.u32 (!%p293_p9), 7, %v376_v14  ;;  %vm433_vm1 = vcmp.ne.s32.totalorder (!%p293_p9), %v413_v16, 0  ;;  %v1501_v20 = vld [vmem:[%s1495_s28 + $0x38] sm:$0xff] (!%p293_p9)  ;;  %v1507_v32 = vld [vmem:[%s1495_s28 + $0x30] sm:$0xff] (!%p293_p9) }
  0x2a   : > { %v1207_v22 = vsel (!%p293_p9), %vm401_vm0, 1.0, %v1394_v21  ;;  %v1209_v23 = vsel (!%p293_p9), %vm433_vm1, 1.0, %v1394_v21  ;;  %v1513_v36 = vld [vmem:[%s1495_s28 + $0x28] sm:$0xff] (!%p293_p9)  ;;  %590 = vst.msk [vmem:[#allocation2 + $0x60] sm:$0xf] (!%p293_p9), %vm517_vm7, %v1398_v39  ;;  %s1400_s8 = smov (!%p293_p9), 8  }
  0x2b   : > { %vm402_vm2 = vcmp.ge.s32.totalorder %v388_v18, 8  ;;  %v407_v24 = vpack.c.bf16 %v1207_v22, %v1207_v22  ;;  %vm434_vm3 = vcmp.ne.s32.totalorder %v420_v19, 0  ;;  %v439_v25 = vpack.c.bf16 %v1209_v23, %v1209_v23  ;;  %518 = vst.msk [vmem:[#allocation2 + $0x18] sm:$0xf] %vm517_vm7, %v1398_v39  ;;  %535 = vst.msk [vmem:[#allocation2 + $0x30] sm:$0xf] %vm517_vm7, %v1398_v39 }
  0x2c   : > { %v1208_v26 = vsel %vm402_vm2, 1.0, %v1394_v21  ;;  %v1210_v27 = vsel %vm434_vm3, 1.0, %v1394_v21  ;;  %604 = vst.msk [vmem:[#allocation2 + $0x78] sm:$0xf] %vm517_vm7, %v1398_v39  ;;  %v1545_v54 = vld [vmem:[%s1495_s28 + $0x50] sm:$0xff]  ;;  %v1548_v55 = vld [vmem:[%s1495_s28 + $0x58] sm:$0xff] }
  0x2d   : > { %v408_v29 = vpack.c.bf16 %v1208_v26, %v1208_v26  ;;  %v440_v30 = vpack.c.bf16 %v1210_v27, %v1210_v27  ;;  %v441_v31 = vmul.bf16 %v439_v25, %v407_v24  ;;  %v1255_v33 = vpack.c.bf16 %v1210_v27, %v1209_v23  ;;  %s1401_s9 = smov 1   ;;  %v1551_v56 = vld [vmem:[%s1495_s28] sm:$0xff]  ;;  %v1556_v59 = vld [vmem:[%s1495_s28 + $0x48] sm:$0xff]  ;;  %s1200_s27 = sshll.u32 %s1376_s20, 1 }
  0x2e   : > { %v1254_v38 = vpack.c.bf16 %v1208_v26, %v1207_v22  ;;  %v1564_v0 = vld [vmem:[%s1495_s28 + $0x20] sm:$0xff]  ;;  %vm465_vm10 = vcmask 1043528   ;;  %vm466_vm11 = vcmask 1047556   ;;  %vm462_vm12 = vcmask 72704   ;;  %p348_p10 = scmp.lt.s32.totalorder %s1380_s21, 1  ;;  %p350_p11 = scmp.lt.s32.totalorder %s1200_s27, 3 }
  0x2f   : > { %v442_v35 = vmul.bf16 %v440_v30, %v408_v29  ;;  %510 = vrot.lane.b32.xlu1 %v1255_v33, %s1395_s18  ;;  %vm1575_vm13 = vmor %vm466_vm11, %vm465_vm10  ;;  %vm491_vm14 = vcmask 1043520   ;;  %vm488_vm15 = vcmask 64512   ;;  %vm526_vm1 = vcmask 1043464   ;;  %p359_p12 = scmp.lt.s32.totalorder %s1376_s20, 1 }
  0x30   : > { %vm1583_vm0 = vmor %vm466_vm11, %vm491_vm14  ;;  %vm523_vm2 = vcmask 7168   ;;  %s1758_s21 = smov (!%p348_p10, %s1380_s21), 1  ;;  %s1760_s27 = smov (!%p350_p11, %s1200_s27), 3 }
  0x31   : > { %v1211_v37 = vcombine.low %v441_v31, %v442_v35  ;;  %vm1594_vm3 = vmor %vm466_vm11, %vm526_vm1  ;;  %s1762_s20 = smov (!%p359_p12, %s1376_s20), 1 }
  0x33   : > { %449 = vrot.lane.b32.xlu0 %v1211_v37, %s1396_s29 }
  0x37   : > { %475 = vrot.lane.b32.xlu0 %v1254_v38, %s1397_s30 }
  0xa1   : > { %v511_v42 = vpop.permute.xlu1 %510 }
  0xa2   : > { %v512_v47 = vrot.slane %v511_v42, 4 }
  0xa4   : > { %v514_v51 = vsel %vm513_vm9, %v511_v42, %v512_v47  ;;  %v1220_v47 = vcombine.high %v1551_v56, %v1510_v34 }
  0xa5   : > { %v450_v40 = vpop.permute.xlu0 %449  ;;  %v589_v52 = vmul.bf16 %v1510_v34, %v514_v51  ;;  %v603_v53 = vmul.bf16 %v1498_v17, %v514_v51  ;;  %v516_v61 = vmul.bf16 %v514_v51, %v1556_v59  ;;  %v534_v62 = vmul.bf16 %v514_v51, %v1548_v55 }
  0xa6   : > { %v451_v41 = vrot.slane %v450_v40, 4  ;;  %v850_v3 = vmul.bf16 %v1513_v36, %v514_v51  ;;  %v864_v4 = vmul.bf16 %v1501_v20, %v514_v51 }
  0xa8   : > { %v453_v43 = vsel %vm452_vm6, %v450_v40, %v451_v41 }
  0xa9   : > { %v476_v44 = vpop.permute.xlu0 %475  ;;  %v558_v45 = vmul.bf16 %v1498_v17, %v453_v43  ;;  %v455_v58 = vmul.bf16 %v453_v43, %v1548_v55  ;;  %v820_v1 = vmul.bf16 %v1501_v20, %v453_v43 }
  0xaa   : > { %v477_v46 = vrot.slane %v476_v44, 4 }
  0xab   : > { %562 = vrot.lane.b32.xlu1 %v558_v45, %s1399_s7 }
  0xac   : > { %v479_v48 = vsel %vm478_vm8, %v476_v44, %v477_v46 }
  0xad   : > { %v569_v49 = vmul.bf16 %v1504_v28, %v479_v48  ;;  %v579_v50 = vmul.bf16 %v1498_v17, %v479_v48  ;;  %v481_v57 = vmul.bf16 %v479_v48, %v1545_v54  ;;  %v495_v60 = vmul.bf16 %v479_v48, %v1548_v55 }
  0xae   : > { %v830_v63 = vmul.bf16 %v1507_v32, %v479_v48  ;;  %v840_v2 = vmul.bf16 %v1501_v20, %v479_v48 }
  0xaf   : > { %572 = vrot.lane.b32.xlu0 %v569_v49, %s1400_s8  ;;  %582 = vrot.lane.b32.xlu1 %v579_v50, %s1400_s8 }
  0xb3   : > { %592 = vrot.lane.b32.xlu0 %v589_v52, %s1401_s9  ;;  %606 = vrot.lane.b32.xlu1 %v603_v53, %s1401_s9  ;;  %v1219_v52 = vcombine.low %v1551_v56, %v1510_v34 }
  0xb7   : > { %485 = vrot.lane.b32.xlu0 %v481_v57, %s1400_s8  ;;  %459 = vrot.lane.b32.xlu1 %v455_v58, %s1399_s7 }
  0xbb   : > { %498 = vrot.lane.b32.xlu0 %v495_v60, %s1400_s8  ;;  %520 = vrot.lane.b32.xlu1 %v516_v61, %s1401_s9 }
  0xbf   : > { %537 = vrot.lane.b32.xlu0 %v534_v62, %s1401_s9  ;;  %833 = vrot.lane.b32.xlu1 %v830_v63, %s1400_s8 }
  0xc3   : > { %823 = vrot.lane.b32.xlu0 %v820_v1, %s1399_s7  ;;  %843 = vrot.lane.b32.xlu1 %v840_v2, %s1400_s8 }
  0xc7   : > { %853 = vrot.lane.b32.xlu0 %v850_v3, %s1401_s9  ;;  %867 = vrot.lane.b32.xlu1 %v864_v4, %s1401_s9  ;;  %v529_v4 = vld [vmem:[%s1495_s28 + $0x40] sm:$0xff]  ;;  %s1201_s28 = sshll.u32 %s1758_s21, 2  ;;  %s1203_s9 = sshll.u32 %s1758_s21, 1 }
  0xc8   : > { %s353_s18 = sadd.s32 %s1201_s28, %s1760_s27  ;;  %s362_s10 = sadd.s32 %s1203_s9, %s1762_s20 }
  0xc9   : > { %s1202_s29 = sshll.u32 %s353_s18, 3  ;;  %s1204_s11 = sshll.u32 %s362_s10, 3 }
  0xca   : > { %s355_s8 = scalar_lea.vmem %s1736_s3, %s1202_s29  ;;  %s364_s14 = scalar_lea.vmem %s1737_s4, %s1204_s11 }
  0xcb   : > { %988 = vperm.xlu0 %1323, %v985_v5   ;;  %v1224_v5 = vcombine.high %v1498_v17, %v1498_v17  ;;  %s372_s17 = scalar_lea.vmem %s1738_s5, %s1204_s11 }
 0x11d   : > { %v563_v6 = vpop.permute.xlu1 %562 }
 0x11e   : > { %v564_v8 = vrot.slane %v563_v6, 4 }
 0x120   : > { %v565_v9 = vsel %vm462_vm12, %v564_v8, %v563_v6 }
 0x121   : > { %567 = vst.msk [vmem:[#allocation2 + $0x48] sm:$0xff] %vm1575_vm13, %v565_v9  ;;  %v573_v10 = vpop.permute.xlu0 %572  ;;  %v583_v11 = vpop.permute.xlu1 %582 }
 0x122   : > { %v574_v13 = vrot.slane %v573_v10, 4  ;;  %v584_v14 = vrot.slane %v583_v11, 4 }
 0x124   : > { %v575_v15 = vsel %vm488_vm15, %v574_v13, %v573_v10  ;;  %v585_v16 = vsel %vm488_vm15, %v584_v14, %v583_v11  ;;  %v1223_v11 = vcombine.low %v1498_v17, %v1498_v17 }
 0x125   : > { %577 = vst.msk [vmem:[#allocation2 + $0x50] sm:$0xff] %vm1583_vm0, %v575_v15  ;;  %587 = vst.msk [vmem:[#allocation2 + $0x58] sm:$0xff] %vm1583_vm0, %v585_v16  ;;  %v593_v18 = vpop.permute.xlu0 %592  ;;  %v607_v19 = vpop.permute.xlu1 %606 }
 0x126   : > { %v594_v22 = vrot.slane %v593_v18, 4  ;;  %v608_v23 = vrot.slane %v607_v19, 4 }
 0x128   : > { %v595_v24 = vsel %vm523_vm2, %v594_v22, %v593_v18  ;;  %v609_v25 = vsel %vm523_vm2, %v608_v23, %v607_v19  ;;  %v1232_v19 = vcombine.high %v529_v4, %v1556_v59 }
 0x129   : > { %597 = vst.msk [vmem:[#allocation2 + $0x60] sm:$0xff] %vm1594_vm3, %v595_v24  ;;  %611 = vst.msk [vmem:[#allocation2 + $0x78] sm:$0xff] %vm1594_vm3, %v609_v25  ;;  %v486_v26 = vpop.permute.xlu0 %485  ;;  %v460_v27 = vpop.permute.xlu1 %459  ;;  %v1231_v25 = vcombine.low %v529_v4, %v1556_v59 }
 0x12a   : > { %v487_v29 = vrot.slane %v486_v26, 4  ;;  %v461_v30 = vrot.slane %v460_v27, 4 }
 0x12c   : > { %v489_v31 = vsel %vm488_vm15, %v487_v29, %v486_v26  ;;  %v463_v33 = vsel %vm462_vm12, %v461_v30, %v460_v27  ;;  %v1324_v35 = vld [vmem:[#allocation2 + $0x4c] ss:$8 sps:$4 sm:$0xff]   ;;  %v1326_v37 = vld [vmem:[#allocation2 + $0x48] ss:$8 sps:$4 sm:$0xff]   ;;  %v1214_v26 = vld [vmem:[%s1734_s1 + $0x4] sm:$0xf]  ;;  %v1236_v29 = vcombine.high %v1548_v55, %v1548_v55  ;;  %v1235_v30 = vcombine.low %v1548_v55, %v1548_v55 }
 0x12d   : > { %493 = vst.msk [vmem:[#allocation2 + $0x8] sm:$0xff] %vm1583_vm0, %v489_v31  ;;  %v499_v38 = vpop.permute.xlu0 %498  ;;  %v521_v40 = vpop.permute.xlu1 %520  ;;  %683 = vmatprep.subr.bf16.mxu0 %v1324_v35  ;;  %v1245_v35 = vcombine.high %v1564_v0, %v1513_v36  ;;  %v1244_v55 = vcombine.low %v1564_v0, %v1513_v36  ;;  %v1248_v36 = vcombine.low %v1501_v20, %v1501_v20 }
 0x12e   : > { %468 = vst.msk [vmem:[#allocation2] sm:$0xff] %vm1575_vm13, %v463_v33  ;;  %v500_v41 = vrot.slane %v499_v38, 4  ;;  %v522_v42 = vrot.slane %v521_v40, 4  ;;  %684 = vmatpush1.bf16.msra.mxu0 %v1326_v37 }
 0x130   : > { %v501_v43 = vsel %vm488_vm15, %v500_v41, %v499_v38  ;;  %v524_v44 = vsel %vm523_vm2, %v522_v42, %v521_v40  ;;  %v1327_v45 = vld [vmem:[#allocation2 + $0x5c] ss:$8 sps:$4 sm:$0xff]   ;;  %v1329_v46 = vld [vmem:[#allocation2 + $0x58] ss:$8 sps:$4 sm:$0xff]   ;;  %v1249_v40 = vcombine.high %v1501_v20, %v1501_v20  ;;  %v1239_v42 = vld [vmem:[%s1734_s1 + $0x8] sm:$0xf] }
 0x131   : > { %503 = vst.msk [vmem:[#allocation2 + $0x10] sm:$0xff] %vm1583_vm0, %v501_v43  ;;  %v538_v48 = vpop.permute.xlu0 %537  ;;  %v834_v49 = vpop.permute.xlu1 %833  ;;  %685 = vmatprep.subr.bf16.mxu0 %v1327_v45  ;;  %v624_v53 = vld [vmem:[#allocation2 + $0x78] sm:$0xff] }
 0x132   : > { %528 = vst.msk [vmem:[#allocation2 + $0x18] sm:$0xff] %vm1594_vm3, %v524_v44  ;;  %v539_v50 = vrot.slane %v538_v48, 4  ;;  %v835_v51 = vrot.slane %v834_v49, 4  ;;  %686 = vmatpush1.bf16.msra.mxu0 %v1329_v46  ;;  %v1222_v3 = vcombine.high %v624_v53, %v1504_v28  ;;  %v1221_v16 = vcombine.low %v624_v53, %v1504_v28 }
 0x133   : > { %687 = vmatprep.subr.bf16.mxu0 %v1220_v47 }
 0x134   : > { %v540_v57 = vsel %vm523_vm2, %v539_v50, %v538_v48  ;;  %v836_v58 = vsel %vm488_vm15, %v835_v51, %v834_v49  ;;  %v549_v61 = vld [vmem:[#allocation2 + $0x8] sm:$0xff] }
 0x135   : > { %v548_v60 = vld [vmem:[#allocation2] sm:$0xff]  ;;  %542 = vst.msk [vmem:[#allocation2 + $0x30] sm:$0xff] %vm1594_vm3, %v540_v57  ;;  %v824_v63 = vpop.permute.xlu0 %823  ;;  %v844_v1 = vpop.permute.xlu1 %843 }
 0x136   : > { %v1330_v62 = vld [vmem:[#allocation2 + $0x4] ss:$8 sps:$4 sm:$0xff]   ;;  %821 = vst.msk [vmem:[#allocation2] sm:$0xf] %vm456_vm4, %v1398_v39  ;;  %v1227_v34 = vcombine.low %v548_v60, %v549_v61  ;;  %v825_v56 = vrot.slane %v824_v63, 4  ;;  %v845_v2 = vrot.slane %v844_v1, 4  ;;  %688 = vmatpush1.bf16.msra.mxu0 %v1219_v52 }
 0x137   : > { %831 = vst.msk [vmem:[#allocation2 + $0x8] sm:$0xf] %vm482_vm5, %v1398_v39  ;;  %778 = vmatprep.subr.bf16.mxu1 %v1330_v62  ;;  %689 = vmatprep.subr.bf16.mxu0 %v1222_v3  ;;  %vm676_vm4 = vcmask 1043456  }
 0x138   : > { %838 = vst.msk [vmem:[#allocation2 + $0x8] sm:$0xff] %vm1583_vm0, %v836_v58  ;;  %779 = vmatpush1.bf16.msra.mxu1 %v1227_v34  ;;  %v550_v6 = vld [vmem:[#allocation2 + $0x10] sm:$0xff]  ;;  %v826_v9 = vsel %vm462_vm12, %v825_v56, %v824_v63  ;;  %v846_v10 = vsel %vm488_vm15, %v845_v2, %v844_v1  ;;  %v678_v28 = vsel %vm676_vm4, %v1223_v11, 0  ;;  %v773_v37 = vsel %vm676_vm4, %v1235_v30, 0 }
 0x139   : > { %v551_v8 = vld [vmem:[#allocation2 + $0x18] sm:$0xff]  ;;  %841 = vst.msk [vmem:[#allocation2 + $0x10] sm:$0xf] %vm482_vm5, %v1398_v39  ;;  %v854_v13 = vpop.permute.xlu0 %853  ;;  %v868_v14 = vpop.permute.xlu1 %867  ;;  %vm672_vm5 = vcmask 588800   ;;  %v937_v41 = vsel %vm676_vm4, %v1248_v36, 0 }
 0x13a   : > { %851 = vst.msk [vmem:[#allocation2 + $0x18] sm:$0xf] %vm517_vm7, %v1398_v39  ;;  %v1230_v15 = vcombine.high %v550_v6, %v551_v8  ;;  %v1229_v18 = vcombine.low %v550_v6, %v551_v8  ;;  %v855_v17 = vrot.slane %v854_v13, 4  ;;  %v869_v22 = vrot.slane %v868_v14, 4  ;;  %690 = vmatpush1.bf16.msra.mxu0 %v1221_v16 }
 0x13b   : > { %828 = vst.msk [vmem:[#allocation2] sm:$0xff] %vm1575_vm13, %v826_v9  ;;  %1225 = vmatprep.subr.msk.bf16.mxu0 %vm676_vm4, %v1224_v5 }
 0x13c   : > { %848 = vst.msk [vmem:[#allocation2 + $0x10] sm:$0xff] %vm1583_vm0, %v846_v10  ;;  %780 = vmatprep.subr.bf16.mxu1 %v1230_v15  ;;  %v554_v23 = vld [vmem:[#allocation2 + $0x30] sm:$0xff]  ;;  %v856_v24 = vsel %vm523_vm2, %v855_v17, %v854_v13  ;;  %v870_v7 = vsel %vm523_vm2, %v869_v22, %v868_v14 }
 0x13d   : > { %781 = vmatpush1.bf16.msra.mxu1 %v1229_v18  ;;  %865 = vst.msk [vmem:[#allocation2 + $0x30] sm:$0xf] %vm517_vm7, %v1398_v39  ;;  %v1234_v12 = vcombine.high %v554_v23, %v1545_v54  ;;  %v1233_v21 = vcombine.low %v554_v23, %v1545_v54 }
 0x13e   : > { %858 = vst.msk [vmem:[#allocation2 + $0x18] sm:$0xff] %vm1594_vm3, %v856_v24  ;;  %782 = vmatprep.subr.bf16.mxu1 %v1232_v19  ;;  %872 = vst.msk [vmem:[#allocation2 + $0x30] sm:$0xff] %vm1594_vm3, %v870_v7  ;;  %692 = vmatpush1.bf16.msra.mxu0 %v678_v28 }
 0x141   : > { %783 = vmatpush1.bf16.msra.mxu1 %v1231_v25  ;;  %1226 = vmatmul.mubr.msk.bf16.vlgmr.msra.gmra.mrb[0].mxu0 %vm672_vm5, %v1214_v26 }
 0x142   : > { %v1332_v59 = vld [vmem:[#allocation2] ss:$8 sps:$4 sm:$0xff]   ;;  %v1334_v27 = vld [vmem:[#allocation2 + $0x4] ss:$8 sps:$4 sm:$0xff]   ;;  %784 = vmatprep.subr.bf16.mxu1 %v1234_v12  ;;  %974 = vmatprep.mubr.bf16.mxu0 %v1398_v39 }
 0x143   : > { %942 = vmatprep.subr.bf16.mxu0 %v1334_v27  ;;  %v547_v39 = vld [vmem:[%s1734_s1] sm:$0xf] }
 0x144   : > { %943 = vmatpush1.bf16.msra.mxu0 %v1332_v59 }
 0x145   : > { %785 = vmatpush1.bf16.msra.mxu1 %v1233_v21  ;;  %v1335_v31 = vld [vmem:[#allocation2 + $0x10] ss:$8 sps:$4 sm:$0xff]   ;;  %v1337_v33 = vld [vmem:[#allocation2 + $0x14] ss:$8 sps:$4 sm:$0xff]  }
 0x146   : > { %1237 = vmatprep.subr.msk.bf16.mxu1 %vm676_vm4, %v1236_v29  ;;  %944 = vmatprep.subr.bf16.mxu0 %v1337_v33  ;;  %v885_v38 = vld [vmem:[#allocation2 + $0x30] sm:$0xff] }
 0x147   : > { %v1247_v54 = vcombine.high %v885_v38, %v1507_v32  ;;  %v1246_v0 = vcombine.low %v885_v38, %v1507_v32 }
 0x148   : > { %945 = vmatpush1.bf16.msra.mxu0 %v1335_v31 }
 0x149   : > { %787 = vmatpush1.bf16.msra.mxu1 %v773_v37  ;;  %946 = vmatprep.subr.bf16.mxu0 %v1245_v35 }
 0x14a   : > { %v989_v52 = vpop.permute.xlu0 %988 }
 0x14c   : > { %1238 = vmatmul.mubr.msk.bf16.vlgmr.msra.gmra.mrb[0].mxu1 %vm672_vm5, %v547_v39  ;;  %947 = vmatpush1.bf16.msra.mxu0 %v1244_v55 }
 0x14d   : > { %948 = vmatprep.subr.bf16.mxu0 %v1247_v54 }
 0x150   : > { %949 = vmatpush1.bf16.msra.mxu0 %v1246_v0 }
 0x151   : > { %1250 = vmatprep.subr.msk.bf16.mxu0 %vm676_vm4, %v1249_v40 }
 0x154   : > { %951 = vmatpush1.bf16.msra.mxu0 %v937_v41 }
 0x157   : > { %1251 = vmatmul.mubr.msk.bf16.vlgmr.msra.gmra.mrb[4].mxu0 %vm672_vm5, %v1239_v42 }
 0x214   : > { %v717_v43 = vpop.f32.mrb[0].mxu0 }
 0x215   : > { %v719_v44 = vpop.f32.mrb[1].mxu0 }
 0x216   : > { %v721_v45 = vpop.f32.mrb[2].mxu0 }
 0x217   : > { %v722_v46 = vpop.f32.mrb[3].mxu0 }
 0x21f   : > { %v812_v20 = vpop.f32.mrb[0].mxu1 }
 0x220   : > { %v813_v32 = vadd.f32 %v812_v20, %v717_v43  ;;  %v814_v47 = vpop.f32.mrb[1].mxu1 }
 0x221   : > { %v815_v48 = vadd.f32 %v814_v47, %v719_v44  ;;  %v816_v49 = vpop.f32.mrb[2].mxu1 }
 0x222   : > { %v817_v50 = vpop.f32.mrb[3].mxu1 }
 0x22a   : > { %v976_v51 = vpop.f32.mrb[4].mxu0 }
 0x22b   : > { %v983_v53 = vadd.f32 %v976_v51, %v813_v32  ;;  %v978_v57 = vpop.f32.mrb[5].mxu0 }
 0x22c   : > { %v984_v58 = vadd.f32 %v978_v57, %v815_v48  ;;  %v980_v60 = vpop.f32.mrb[6].mxu0 }
 0x22d   : > { %v991_v61 = vadd.f32 %v989_v52, %v983_v53  ;;  %v981_v62 = vpop.f32.mrb[7].mxu0 }
 0x22e   : > { %v992_v63 = vadd.f32 %v989_v52, %v984_v58 }
 0x22f   : > { %993 = vst [vmem:[%s355_s8] sm:$0xff] %v991_v61  ;;  %v1000_v1 = vmul.f32 %v991_v61, %v991_v61 }
 0x230   : > { %994 = vst [vmem:[%s355_s8 + $0x8] sm:$0xff] %v992_v63  ;;  %v995_v34 = vadd.f32 %v992_v63, %v991_v61  ;;  %v1001_v56 = vmul.f32 %v992_v63, %v992_v63 }
 0x232   : > { %996 = vadd.xlane.f32.xlu1 %v995_v34  ;;  %v1002_v2 = vadd.f32 %v1001_v56, %v1000_v1 }
 0x234   : > { %1003 = vadd.xlane.f32.xlu0 %v1002_v2 }
 0x2bf   : > { %v997_v3 = vpop.xlane.xlu1 %996 }
 0x2c0   : > { %999 = vst.msk [vmem:[%s364_s14] sm:$0xff] %vm523_vm2, %v997_v3 }
 0x2c1   : > { %v1004_v4 = vpop.xlane.xlu0 %1003 }
 0x2c2   : > { %1005 = vst.msk [vmem:[%s372_s17] sm:$0xff] %vm523_vm2, %v1004_v4 }
 0x2c3 PF: > { %s16_s24 = sadd.s32 1, %s1392_s24   ;;  %s1745_s18 = smov %s1372_s19 }
 0x2c4   : > { %p13_p13 = scmp.ge.s32.totalorder %s16_s24, 6   ;;  %s1746_s19 = smov %s1483_s6 }
 0x2c5   : > { %s1747_s20 = smov %s1384_s22  ;;  %s1748_s21 = smov %s1388_s23 }
 0x2c6   : > { %s1749_s22 = smov %s1752_s25  ;;  %s1750_s23 = smov %s1756_s26 }
 0x2c7   :  { %15 = sbr.rel (!%p13_p13) target bundleno = 4 (0x4), region = 132 }

// kernel: unet_down_forward.3
= control target key start
LH: loop header
LB: loop body
LE: loop exit
PB: predicated region body
PF: predicated region fallthrough
CT: control target
= control target key end

     0   :  { %s502_s12 = smov 0   ;;  %s504_s13 = smov 0   ;;  %s562_s0 = inlined_call_operand.vmem [shape: f32[2,8,512], index: 0, kind: input, shape index: {}, may-alias: {0,3}]   ;;  %s563_s1 = inlined_call_operand.vmem [shape: f32[2,8,1], index: 1, kind: input, shape index: {}]   ;;  %s564_s2 = inlined_call_operand.vmem [shape: f32[2,8,1], index: 2, kind: input, shape index: {}]   ;;  %s565_s3 = inlined_call_operand.vmem [shape: f32[2,8,512], index: 3, kind: output, shape index: {}, may-alias: {0,3}]  }
   0x1   :  { %s506_s14 = smov 0   ;;  %s508_s15 = smov 0  }
   0x2   :  { %s510_s16 = smov 0  }
   0x3 LB: > { %s22_s17 = sadd.s32 1, %s471_s14  ;;  %s25_s18 = sadd.s32 1, %s475_s15  ;;  %s479_s16 = sphi %s510_s16, %s13_s16   ;;  %s475_s15 = sphi %s508_s15, %s569_s15   ;;  %s471_s14 = sphi %s506_s14, %s568_s14   ;;  %s467_s13 = sphi %s504_s13, %s567_s13   ;;  %s463_s12 = sphi %s502_s12, %s566_s12  }
   0x4   : > { %p23_p0 = scmp.ge.s32.totalorder %s22_s17, 2  ;;  %p388_p1 = scmp.ge.s32.totalorder %s479_s16, 1 }
   0x5   : > { %p176_p2 = scmp.lt.s32.totalorder %s479_s16, 5 }
   0x6   : > { %s571_s17 = smov (%p23_p0, %s22_s17), 0  ;;  %s573_s18 = smov (!%p23_p0, %s25_s18), %s475_s15 }
   0x7   : > { %p177_p3 = pnand %p388_p1, %p176_p2  ;;  %p27_p4 = scmp.ge.s32.totalorder %s573_s18, 2 }
   0x8   : > { %p217_p5 = scmp.lt.s32.totalorder (!%p177_p3), %s467_s13, 1  ;;  %v481_v0 = vmov (!%p177_p3), 0   ;;  %s389_s26 = sshll.u32 (!%p177_p3), %s463_s12, 1 }
   0x9   : > { %s575_s18 = smov (%p27_p4, %s573_s18), 0  ;;  %180 = sbr.rel (%p177_p3) target bundleno = 158 (0x9e), region = 32 }
   0xa   : > { %440 = vset.pattern.permute.xlu0 (!%p177_p3), %v481_v0  ;;  %p219_p6 = scmp.lt.s32.totalorder (!%p177_p3), %s389_s26, 3 }
  0x10   : > { %s577_s13 = smov (!%p217_p5, %s467_s13), 1  ;;  %s579_s26 = smov (!%p219_p6, %s389_s26), 3 }
  0x11   : > { %s392_s19 = sshll.u32 %s577_s13, 3  ;;  %s390_s27 = sshll.u32 %s577_s13, 2 }
  0x12   : > { %s229_s22 = scalar_lea.vmem %s563_s1, %s392_s19  ;;  %s233_s25 = scalar_lea.vmem %s564_s2, %s392_s19 }
  0x13   : > { %v246_v1 = vld [vmem:[%s229_s22] sm:$0xff]  ;;  %s222_s28 = sadd.s32 %s390_s27, %s579_s26 }
  0x14   : > { %249 = vperm.xlu0 %440, %v246_v1   ;;  %v254_v2 = vld [vmem:[%s233_s25] sm:$0xff]  ;;  %s391_s29 = sshll.u32 %s222_s28, 3 }
  0x15   : > { %s224_s5 = scalar_lea.vmem %s562_s0, %s391_s29  ;;  %s242_s8 = scalar_lea.vmem %s565_s3, %s391_s29 }
  0x16   : > { %v244_v4 = vld [vmem:[%s224_s5] sm:$0xff]  ;;  %v245_v5 = vld [vmem:[%s224_s5 + $0x8] sm:$0xff] }
  0x18   : > { %257 = vperm.xlu0 %440, %v254_v2  }
  0x93   : > { %v250_v3 = vpop.permute.xlu0 %249 }
  0x94   : > { %v252_v6 = vsub.f32 %v244_v4, %v250_v3  ;;  %v253_v7 = vsub.f32 %v245_v5, %v250_v3 }
  0x97   : > { %v258_v8 = vpop.permute.xlu0 %257 }
  0x98   : > { %v260_v9 = vmul.f32 %v258_v8, %v252_v6  ;;  %v261_v10 = vmul.f32 %v258_v8, %v253_v7 }
  0x9a   : > { %vm262_vm0 = vcmp.ge.f32.partialorder %v260_v9, 0.0  ;;  %vm263_vm1 = vcmp.ge.f32.partialorder %v261_v10, 0.0  ;;  %v264_v11 = vmul.f32 0.2, %v260_v9  ;;  %v265_v12 = vmul.f32 0.2, %v261_v10 }
  0x9c   : > { %v266_v13 = vsel %vm262_vm0, %v260_v9, %v264_v11  ;;  %v267_v14 = vsel %vm263_vm1, %v261_v10, %v265_v12 }
  0x9d   : > { %268 = vst [vmem:[%s242_s8] sm:$0xff] %v266_v13  ;;  %269 = vst [vmem:[%s242_s8 + $0x8] sm:$0xff] %v267_v14 }
  0x9e PF: > { %s13_s16 = sadd.s32 1, %s479_s16   ;;  %s566_s12 = smov %s471_s14 }
  0x9f   : > { %p10_p7 = scmp.ge.s32.totalorder %s13_s16, 6   ;;  %s567_s13 = smov %s475_s15 }
  0xa0   : > { %s568_s14 = smov %s571_s17  ;;  %s569_s15 = smov %s575_s18 }
  0xa1   :  { %12 = sbr.rel (!%p10_p7) target bundleno = 3 (0x3), region = 68 }

</bundles_post_ra>
